<compile_context>
chip_gen: v7x
topology: tpu7x:2x2x1
jax: 0.10.0
libtpu: 0.0.40
codegen_flags: <defaults>
</compile_context>

<pallas_src>
import math
from functools import partial

import jax
import jax.numpy as jnp
from jax.experimental import pallas as pl
from jax.experimental.pallas import tpu as pltpu


# ----------------------------------------------------------------------------
# Capability probes (construction-time only; safe fallbacks).
# ----------------------------------------------------------------------------
def _detect_single_buffer():
    if not hasattr(pl, "Buffered"):
        return False
    try:
        pl.BlockSpec((8, 128), lambda i: (0, 0), pipeline_mode=pl.Buffered(1))
        return True
    except Exception:
        return False


_HAS_SINGLE_BUFFER = _detect_single_buffer()


def _vmem_capacity_bytes():
    try:
        info = pltpu.get_tpu_info()
        cap = getattr(info, "vmem_capacity_bytes", None)
        if cap:
            return int(cap)
    except Exception:
        pass
    return 64 << 20  # conservative (v7x-sized) default


# ----------------------------------------------------------------------------
# Math helpers
# ----------------------------------------------------------------------------
def _gelu(x, approximate=False):
    if approximate:
        # tanh approximation -> EUP slot (nearly free when MXU-bound; use on v5e).
        c = math.sqrt(2.0 / math.pi)
        return 0.5 * x * (1.0 + jnp.tanh(c * (x + 0.044715 * (x * x * x))))
    # PyTorch nn.GELU default = exact erf formulation.
    return 0.5 * x * (1.0 + jax.lax.erf(x * (1.0 / math.sqrt(2.0))))


def _round_up(a, m):
    return ((a + m - 1) // m) * m


# ----------------------------------------------------------------------------
# Kernel
# ----------------------------------------------------------------------------
def mlp_kernel(x_ref, w1_ref, b1_ref, w2_ref, b2_ref, o_ref, acc_ref, *,
               approximate_gelu):
    # Grid = (row tiles [parallel], hidden slabs [arbitrary/reduction]).
    k = pl.program_id(1)

    @pl.when(k == 0)
    def _():
        acc_ref[...] = jnp.zeros_like(acc_ref)

    # fc1 slab: (tm, IN) @ (IN, thid) -> f32 (tm, thid); no operand upcast.
    h = jnp.dot(x_ref[...], w1_ref[...], preferred_element_type=jnp.float32)
    h = h + b1_ref[...].astype(jnp.float32)
    h = _gelu(h, approximate_gelu)

    # fc2 partial: (tm, thid) @ (thid, OUT), accumulated in f32.
    acc_ref[...] += jnp.dot(h.astype(w2_ref.dtype), w2_ref[...],
                            preferred_element_type=jnp.float32)

    @pl.when(k == pl.num_programs(1) - 1)
    def _():
        o_ref[...] = (acc_ref[...] + b2_ref[...].astype(jnp.float32)
                      ).astype(o_ref.dtype)


# ----------------------------------------------------------------------------
# VMEM / tiling planner
# ----------------------------------------------------------------------------
def _plan_vmem_bytes(tm, in_f, thid, out_f, hid_steps, w_isz, x_isz):
    resident = (hid_steps == 1)
    # Resident weights are single-buffered (Buffered(1)); streamed slabs are
    # double-buffered by the Pallas pipeline.
    wbuf = 1 if (resident and _HAS_SINGLE_BUFFER) else 2
    weights = wbuf * (in_f * thid + thid * out_f + thid + out_f) * w_isz
    io = 2 * tm * in_f * x_isz + 2 * tm * out_f * x_isz     # x / out tiles (2-buf)
    scratch = tm * out_f * 4 + tm * thid * 4                # f32 acc + fc1 intermediate
    return weights + io + scratch


def _hid_candidates(HID):
    """Hidden-dim slab candidates: large multiples of 256 (>=512 preferred)."""
    cands = []
    t = HID
    while True:
        t = _round_up(pl.cdiv(t, 2), 256)
        if t >= HID or t < 512:
            break
        if t not in cands:
            cands.append(t)
    for t in (512, 256, 128):
        if t < HID and t not in cands:
            cands.append(t)
    return cands


def _choose_plan(M, IN, HID, OUT, w_isz, x_isz, budget, tm_cap, hid_tile):
    # Row tile: minimize padding while keeping >=2 row tiles when possible so
    # both v7x TensorCores get work on the "parallel" axis.
    if M >= 16:
        n_row = max(2, pl.cdiv(M, tm_cap))
    else:
        n_row = 1
    tm = max(8, min(tm_cap, _round_up(pl.cdiv(M, n_row), 8)))

    def fits(tm_, thid_):
        steps = pl.cdiv(HID, thid_) if thid_ < HID else 1
        return _plan_vmem_bytes(tm_, IN, thid_, OUT, steps, w_isz, x_isz) <= budget

    if hid_tile is not None:  # explicit user override
        thid = min(_round_up(hid_tile, 128), HID)
        return tm, thid

    # Preferred: both weight matrices fully resident (fetched from HBM once).
    if fits(tm, HID):
        return tm, HID

    # Fallback: tile HID with large slabs; shrink thid before ever shrinking tm.
    cands = _hid_candidates(HID)
    for thid in cands:
        if fits(tm, thid):
            return tm, thid

    t = tm
    while t > 64:
        t = _round_up(max(t // 2, 8), 8)
        for thid in [HID] + cands:
            if fits(t, thid):
                return t, thid

    # Last resort: smallest sensible plan (never silently emit a huge plan).
    return _round_up(min(tm, 64), 8), (cands[-1] if cands else HID)


# ----------------------------------------------------------------------------
# Wrapper
# ----------------------------------------------------------------------------
def mlp_forward(x, w1, b1, w2, b2, *, tm=256, hid_tile=None,
                approximate_gelu=False, compute_dtype=None):
    """x: (B, N, in_features) -> (B, N, out_features).

    tm:            max row tile (tokens per grid step); actual tile is chosen
                   to minimize padding while keeping >=2 row tiles.
    hid_tile:      optional explicit hidden-dim tile (multiple of 128). By
                   default the planner keeps weights fully VMEM-resident and
                   only tiles HID when the VMEM budget requires it.
    compute_dtype: e.g. jnp.bfloat16 to run f32 inputs through the MXU in
                   bf16 with f32 accumulation (faster, halves DMA bytes).
    """
    B, N, IN = x.shape
    HID = w1.shape[1]
    OUT = w2.shape[1]
    M = B * N
    out_dtype = x.dtype

    if compute_dtype is not None:
        x = x.astype(compute_dtype)
        w1 = w1.astype(compute_dtype)
        b1 = b1.astype(compute_dtype)
        w2 = w2.astype(compute_dtype)
        b2 = b2.astype(compute_dtype)

    w_isz = jnp.dtype(w1.dtype).itemsize
    x_isz = jnp.dtype(x.dtype).itemsize

    # Generation-aware VMEM budget (v7x: 64 MiB physical, v5e/v6e: 128 MiB).
    vmem_cap = _vmem_capacity_bytes()
    budget = int(0.70 * vmem_cap)

    tm, thid = _choose_plan(M, IN, HID, OUT, w_isz, x_isz, budget, tm, hid_tile)
    assert tm % 8 == 0
    if thid < HID:
        assert thid % 128 == 0

    # Pad token and hidden dims so every grid step uses full-size tiles.
    Mp = pl.cdiv(M, tm) * tm
    HIDp = pl.cdiv(HID, thid) * thid
    hid_steps = HIDp // thid
    resident = (hid_steps == 1)

    x2d = x.reshape(M, IN)
    if Mp != M:
        x2d = jnp.pad(x2d, ((0, Mp - M), (0, 0)))
    w1p = w1
    b1p = b1.reshape(1, HID)
    w2p = w2
    if HIDp != HID:
        # Zero-padded hidden columns: gelu(0)=0 and the padded w2 rows are
        # zero, so padding contributes nothing to the output.
        w1p = jnp.pad(w1p, ((0, 0), (0, HIDp - HID)))
        b1p = jnp.pad(b1p, ((0, 0), (0, HIDp - HID)))
        w2p = jnp.pad(w2p, ((0, HIDp - HID), (0, 0)))
    b2p = b2.reshape(1, OUT)

    plan_bytes = _plan_vmem_bytes(tm, IN, thid, OUT, hid_steps, w_isz, x_isz)
    vmem_limit = int(max(int(1.25 * plan_bytes) + (4 << 20), 32 << 20))
    vmem_limit = int(min(vmem_limit, int(0.9 * vmem_cap)))

    def _spec(block_shape, index_map, single_buffer):
        if single_buffer and _HAS_SINGLE_BUFFER:
            return pl.BlockSpec(block_shape, index_map,
                                pipeline_mode=pl.Buffered(1))
        return pl.BlockSpec(block_shape, index_map)

    in_specs = [
        pl.BlockSpec((tm, IN), lambda i, k: (i, 0)),                # x row tile
        _spec((IN, thid), lambda i, k: (0, k), resident),           # w1
        _spec((1, thid), lambda i, k: (0, k), resident),            # b1
        _spec((thid, OUT), lambda i, k: (k, 0), resident),          # w2
        _spec((1, OUT), lambda i, k: (0, 0), True),                 # b2 (constant)
    ]

    kernel = partial(mlp_kernel, approximate_gelu=approximate_gelu)

    out2d = pl.pallas_call(
        kernel,
        out_shape=jax.ShapeDtypeStruct((Mp, OUT), out_dtype),
        grid_spec=pltpu.PrefetchScalarGridSpec(
            num_scalar_prefetch=0,
            grid=(Mp // tm, hid_steps),              # reduction (HID) axis last
            in_specs=in_specs,
            out_specs=pl.BlockSpec((tm, OUT), lambda i, k: (i, 0)),
            scratch_shapes=[pltpu.VMEM((tm, OUT), jnp.float32)],
        ),
        compiler_params=pltpu.CompilerParams(
            dimension_semantics=("parallel", "arbitrary"),
            vmem_limit_bytes=vmem_limit),
    )(x2d, w1p, b1p, w2p, b2p)

    return out2d[:M].reshape(B, N, OUT)


# ----------------------------------------------------------------------------
# Parameter init (mimics nn.Linear defaults) and self-test
# ----------------------------------------------------------------------------
def init_mlp_params(key, in_features, hidden_features, out_features,
                    dtype=jnp.float32):
    k1, k2, k3, k4 = jax.random.split(key, 4)
    lim1 = 1.0 / math.sqrt(in_features)
    lim2 = 1.0 / math.sqrt(hidden_features)
    # stored as (in, out) so the kernel does x @ W (PyTorch stores (out, in) and does x @ W.T)
    w1 = jax.random.uniform(k1, (in_features, hidden_features), dtype, -lim1, lim1)
    b1 = jax.random.uniform(k2, (hidden_features,), dtype, -lim1, lim1)
    w2 = jax.random.uniform(k3, (hidden_features, out_features), dtype, -lim2, lim2)
    b2 = jax.random.uniform(k4, (out_features,), dtype, -lim2, lim2)
    return w1, b1, w2, b2


if __name__ == "__main__":
    # Small but lane-friendly channel dims; N=197 exercises the row-padding path.
    B, N = 2, 197
    IN, HID, OUT = 128, 256, 128

    key = jax.random.PRNGKey(0)
    kx, kp = jax.random.split(key)
    x = jax.random.normal(kx, (B, N, IN), dtype=jnp.float32)
    w1, b1, w2, b2 = init_mlp_params(kp, IN, HID, OUT)

    h_ref = _gelu(x @ w1 + b1, approximate=False)
    y_ref = h_ref @ w2 + b2

    # 1) f32 path, planner-chosen tiles (weights fully resident, >=2 row tiles).
    y = mlp_forward(x, w1, b1, w2, b2)
    y = jax.block_until_ready(y)
    assert y.shape == (B, N, OUT)
    assert jnp.allclose(y, y_ref, atol=1e-3, rtol=1e-3), "f32 mismatch vs reference"

    # 2) Forced HID-tiling path (exercises the reduction/accumulator grid axis).
    y_t = mlp_forward(x, w1, b1, w2, b2, hid_tile=128)
    y_t = jax.block_until_ready(y_t)
    assert jnp.allclose(y_t, y_ref, atol=1e-3, rtol=1e-3), "tiled-HID mismatch"

    # 3) bf16 fast path (operands fed straight to the MXU, f32 accumulation).
    to_bf16 = lambda a: a.astype(jnp.bfloat16)
    yb = mlp_forward(to_bf16(x), to_bf16(w1), to_bf16(b1),
                     to_bf16(w2), to_bf16(b2))
    yb = jax.block_until_ready(yb)
    assert yb.shape == (B, N, OUT)
    err = float(jnp.max(jnp.abs(yb.astype(jnp.float32) - y_ref)))
    assert err < 0.1, f"bf16 path too far from f32 reference ({err})"

    print("KERNEL_OK")
</pallas_src>

<mosaic_0001>
module attributes {stable_mosaic.version = 11 : i64} {
  func.func @mlp_kernel(%arg0: i32, %arg1: i32, %arg2: memref<200x128xf32, #tpu.memory_space<vmem>>, %arg3: memref<128x256xf32, #tpu.memory_space<vmem>>, %arg4: memref<1x256xf32, #tpu.memory_space<vmem>>, %arg5: memref<256x128xf32, #tpu.memory_space<vmem>>, %arg6: memref<1x128xf32, #tpu.memory_space<vmem>>, %arg7: memref<200x128xf32, #tpu.memory_space<vmem>>, %arg8: memref<200x128xf32, #tpu.memory_space<vmem>>) attributes {dimension_semantics = [#tpu.dimension_semantics<parallel>, #tpu.dimension_semantics<arbitrary>], iteration_bounds = array<i64: 2, 1>, scalar_prefetch = 0 : i64, scratch_operands = 1 : i64, tpu.core_type = #tpu.core_type<tc>, window_params = [{transform_indices = @transform_0, window_bounds = array<i64: 200, 128>}, {pipeline_mode = #tpu.pipeline_mode<synchronous>, transform_indices = @transform_1, window_bounds = array<i64: 128, 256>}, {pipeline_mode = #tpu.pipeline_mode<synchronous>, transform_indices = @transform_2, window_bounds = array<i64: 1, 256>}, {pipeline_mode = #tpu.pipeline_mode<synchronous>, transform_indices = @transform_3, window_bounds = array<i64: 256, 128>}, {pipeline_mode = #tpu.pipeline_mode<synchronous>, transform_indices = @transform_4, window_bounds = array<i64: 1, 128>}, {transform_indices = @transform_5, window_bounds = array<i64: 200, 128>}]} {
    %c0_i32 = arith.constant 0 : i32
    %0 = arith.cmpi eq, %arg1, %c0_i32 : i32
    %1 = arith.extui %0 : i1 to i32
    %c0_i32_0 = arith.constant 0 : i32
    %2 = arith.cmpi ne, %1, %c0_i32_0 : i32
    scf.if %2 {
      %cst_18 = arith.constant 0.000000e+00 : f32
      %25 = vector.broadcast %cst_18 : f32 to vector<200x128xf32>
      %c0_19 = arith.constant 0 : index
      %c0_20 = arith.constant 0 : index
      %26 = vector.load %arg8[%c0_19, %c0_20] : memref<200x128xf32, #tpu.memory_space<vmem>>, vector<200x128xf32>
      tpu.vector_store %arg8[%c0_19, %c0_20], %25 {strides = array<i32>} : memref<200x128xf32, #tpu.memory_space<vmem>>, vector<200x128xf32>,
    } else {
    }
    %c0 = arith.constant 0 : index
    %c0_1 = arith.constant 0 : index
    %3 = vector.load %arg2[%c0, %c0_1] : memref<200x128xf32, #tpu.memory_space<vmem>>, vector<200x128xf32>
    %c0_2 = arith.constant 0 : index
    %c0_3 = arith.constant 0 : index
    %4 = vector.load %arg3[%c0_2, %c0_3] : memref<128x256xf32, #tpu.memory_space<vmem>>, vector<128x256xf32>
    %cst = arith.constant dense<0.000000e+00> : vector<200x256xf32>
    %5 = tpu.matmul %3, %4, %cst {dimension_numbers = #tpu.dot_dimension_numbers<[1], [0], [0], [1], [0, 0, 1, 1], [], []>} : vector<200x128xf32>, vector<128x256xf32>, vector<200x256xf32> -> vector<200x256xf32>
    %c0_4 = arith.constant 0 : index
    %c0_5 = arith.constant 0 : index
    %6 = vector.load %arg4[%c0_4, %c0_5] : memref<1x256xf32, #tpu.memory_space<vmem>>, vector<1x256xf32>
    %7 = vector.broadcast %6 : vector<1x256xf32> to vector<200x256xf32>
    %8 = arith.addf %5, %7 : vector<200x256xf32>
    %cst_6 = arith.constant 5.000000e-01 : f32
    %9 = vector.broadcast %cst_6 : f32 to vector<200x256xf32>
    %10 = arith.mulf %9, %8 : vector<200x256xf32>
    %cst_7 = arith.constant 0.707106769 : f32
    %11 = vector.broadcast %cst_7 : f32 to vector<200x256xf32>
    %12 = arith.mulf %8, %11 : vector<200x256xf32>
    %13 = math.erf %12 : vector<200x256xf32>
    %cst_8 = arith.constant 1.000000e+00 : f32
    %14 = vector.broadcast %cst_8 : f32 to vector<200x256xf32>
    %15 = arith.addf %14, %13 : vector<200x256xf32>
    %16 = arith.mulf %10, %15 : vector<200x256xf32>
    %c0_9 = arith.constant 0 : index
    %c0_10 = arith.constant 0 : index
    %17 = vector.load %arg8[%c0_9, %c0_10] : memref<200x128xf32, #tpu.memory_space<vmem>>, vector<200x128xf32>
    %c0_11 = arith.constant 0 : index
    %c0_12 = arith.constant 0 : index
    %18 = vector.load %arg5[%c0_11, %c0_12] : memref<256x128xf32, #tpu.memory_space<vmem>>, vector<256x128xf32>
    %cst_13 = arith.constant dense<0.000000e+00> : vector<200x128xf32>
    %19 = tpu.matmul %16, %18, %cst_13 {dimension_numbers = #tpu.dot_dimension_numbers<[1], [0], [0], [1], [0, 0, 1, 1], [], []>} : vector<200x256xf32>, vector<256x128xf32>, vector<200x128xf32> -> vector<200x128xf32>
    %20 = arith.addf %17, %19 : vector<200x128xf32>
    %c0_14 = arith.constant 0 : index
    %c0_15 = arith.constant 0 : index
    %21 = vector.load %arg8[%c0_14, %c0_15] : memref<200x128xf32, #tpu.memory_space<vmem>>, vector<200x128xf32>
    tpu.vector_store %arg8[%c0_14, %c0_15], %20 {strides = array<i32>} : memref<200x128xf32, #tpu.memory_space<vmem>>, vector<200x128xf32>,
    %c0_i32_16 = arith.constant 0 : i32
    %22 = arith.cmpi eq, %arg1, %c0_i32_16 : i32
    %23 = arith.extui %22 : i1 to i32
    %c0_i32_17 = arith.constant 0 : i32
    %24 = arith.cmpi ne, %23, %c0_i32_17 : i32
    scf.if %24 {
      %c0_18 = arith.constant 0 : index
      %c0_19 = arith.constant 0 : index
      %25 = vector.load %arg8[%c0_18, %c0_19] : memref<200x128xf32, #tpu.memory_space<vmem>>, vector<200x128xf32>
      %c0_20 = arith.constant 0 : index
      %c0_21 = arith.constant 0 : index
      %26 = vector.load %arg6[%c0_20, %c0_21] : memref<1x128xf32, #tpu.memory_space<vmem>>, vector<1x128xf32>
      %27 = vector.broadcast %26 : vector<1x128xf32> to vector<200x128xf32>
      %28 = arith.addf %25, %27 : vector<200x128xf32>
      %c0_22 = arith.constant 0 : index
      %c0_23 = arith.constant 0 : index
      %29 = vector.load %arg7[%c0_22, %c0_23] : memref<200x128xf32, #tpu.memory_space<vmem>>, vector<200x128xf32>
      tpu.vector_store %arg7[%c0_22, %c0_23], %28 {strides = array<i32>} : memref<200x128xf32, #tpu.memory_space<vmem>>, vector<200x128xf32>,
    } else {
    }
    return
  }
  func.func @transform_0(%arg0: i32, %arg1: i32) -> (i32, i32) {
    %c0_i32 = arith.constant 0 : i32
    %c0_i32_0 = arith.constant 0 : i32
    return %arg0, %c0_i32 : i32, i32
  }
  func.func @transform_1(%arg0: i32, %arg1: i32) -> (i32, i32) {
    %c0_i32 = arith.constant 0 : i32
    %c0_i32_0 = arith.constant 0 : i32
    return %c0_i32, %arg1 : i32, i32
  }
  func.func @transform_2(%arg0: i32, %arg1: i32) -> (i32, i32) {
    %c0_i32 = arith.constant 0 : i32
    %c0_i32_0 = arith.constant 0 : i32
    return %c0_i32, %arg1 : i32, i32
  }
  func.func @transform_3(%arg0: i32, %arg1: i32) -> (i32, i32) {
    %c0_i32 = arith.constant 0 : i32
    %c0_i32_0 = arith.constant 0 : i32
    return %arg1, %c0_i32 : i32, i32
  }
  func.func @transform_4(%arg0: i32, %arg1: i32) -> (i32, i32) {
    %c0_i32 = arith.constant 0 : i32
    %c0_i32_0 = arith.constant 0 : i32
    %c0_i32_1 = arith.constant 0 : i32
    return %c0_i32, %c0_i32_0 : i32, i32
  }
  func.func @transform_5(%arg0: i32, %arg1: i32) -> (i32, i32) {
    %c0_i32 = arith.constant 0 : i32
    %c0_i32_0 = arith.constant 0 : i32
    return %arg0, %c0_i32 : i32, i32
  }
}

</mosaic_0001>

<bundles_post_ra>
// kernel: tpu_custom_call.1
= control target key start
LH: loop header
LB: loop body
LE: loop exit
PB: predicated region body
PF: predicated region fallthrough
CT: control target
= control target key end

     0   :  { %10 = vsyncpa [#allocation4], 0  ;;  %s2550_s0 = inlined_call_operand.hbm [shape: f32[400,128], index: 0, kind: input, shape index: {}]   ;;  %s2551_s1 = inlined_call_operand.hbm [shape: f32[128,256], index: 1, kind: input, shape index: {}]   ;;  %s2552_s2 = inlined_call_operand.vmem [shape: f32[1,256], index: 2, kind: input, shape index: {}]   ;;  %s2553_s3 = inlined_call_operand.hbm [shape: f32[256,128], index: 3, kind: input, shape index: {}]   ;;  %s2554_s4 = inlined_call_operand.vmem [shape: f32[1,128], index: 4, kind: input, shape index: {}]   ;;  %s2555_s5 = inlined_call_operand.hbm [shape: f32[400,128], index: 5, kind: output, shape index: {}]  }
   0x1   :  { %12 = vsyncpa [#allocation4 + $0x1], 0 }
   0x2   :  { %13 = vsyncpa [#allocation7], 0 }
   0x3   :  { %14 = vsyncpa [#allocation5], 0 }
   0x4   :  { %16 = vsyncpa [#allocation5 + $0x1], 0  ;;  %s1936_s18 = smov 0   ;;  %s1938_s19 = smov 0  }
   0x5   :  { %s1940_s20 = smov 0   ;;  %s1942_s21 = smov 0  }
   0x6   :  { %s1944_s22 = smov 0   ;;  %s1946_s23 = smov 0  }
   0x7 LB: > { %s1398_s24 = sadd.s32 4294967295, %s1892_s23   ;;  %s1399_s25 = sadd.s32 4294967294, %s1892_s23   ;;  %s1892_s23 = sphi %s1946_s23, %s22_s23   ;;  %s1888_s22 = sphi %s1944_s22, %s2581_s22   ;;  %s1884_s21 = sphi %s1942_s21, %s2580_s21   ;;  %s1880_s20 = sphi %s1940_s20, %s2579_s20   ;;  %s1876_s19 = sphi %s1938_s19, %s2578_s19   ;;  %s1872_s18 = sphi %s1936_s18, %s2577_s18  }
   0x8   : > { %p54_p0 = scmp.ne.s32.totalorder %s1876_s19, %s1872_s18  ;;  %p1970_p1 = scmp.eq.s32.totalorder %s1398_s24, 0 }
   0x9   : > { %p1974_p2 = scmp.eq.s32.totalorder %s1398_s24, 1  ;;  %p183_p3 = scmp.eq.s32.totalorder %s1399_s25, 1 }
   0xa   : > { %s2562_s26 = scalar_select %p1970_p1, 1, 0 }
   0xb   : > { %p1980_p4 = por %p1970_p1, %p54_p0  ;;  %p1400_p5 = scmp.ge.s32.totalorder %s1892_s23, 1 }
   0xc   : > { %p1985_p6 = por %p183_p3, %p54_p0  ;;  %p190_p7 = scmp.lt.s32.totalorder %s1892_s23, 3 }
   0xd   : > { %s2564_s28 = scalar_select %p1980_p4, 1, 0 }
   0xe   : > { %s2565_s29 = scalar_select %p1985_p6, 1, 0 }
   0xf   : > { %p1990_p8 = pnand %p1400_p5, %p190_p7  ;;  %s1894_s6 = smov [#allocation6]  }
  0x10   : > { %s205_s7 = sshll.u32 %s1894_s6, 4  ;;  %s1895_s9 = smov [#allocation8]   ;;  %s1994_s7 = int_to_ptr.vmem [resolvable:$true] %s205_s7 }
  0x11   : > { %p1541_p9 = pneg %p1990_p8  ;;  %s229_s10 = sshll.u32 %s1895_s9, 4  ;;  %s2005_s10 = int_to_ptr.vmem [resolvable:$true] %s229_s10 }
  0x12   : > { %s1720_s13 = scalar_lea.hbm %s2551_s1, 4096 }
  0x13   : > { %p2001_p11 = pnand %p1541_p9, %p1970_p1  ;;  %p1721_p12 = scmp.ne.s32.totalorder %s2551_s1, %s1720_s13 }
  0x14   : > { %p1727_p5 = scmp.lt.u32.totalorder %s1720_s13, %s2551_s1 }
  0x15   : > { %p1722_p13 = pneg %p2001_p11 }
  0x17   : > { %p1723_p0 = pnand %p1722_p13, %p1721_p12 }
  0x19   : > { %p1724_p3 = pneg %p1723_p0 }
  0x1b   : > { %p1729_p7 = pnand %p1727_p5, %p1724_p3 }
  0x1d   : > { %1732 = shalt.err (!%p1729_p7)
}
  0x1e   : > { %s1733_s24 = scalar_lea.vmem %s1994_s7, 4096  ;;  %p1741_p1 = scmp.lt.s32.totalorder %s1994_s7, %s1994_s7 }
  0x1f   : > { %p1734_p9 = scmp.ne.s32.totalorder %s1994_s7, %s1733_s24  ;;  %p1742_p12 = scmp.lt.s32.totalorder %s1733_s24, %s1733_s24 }
  0x21   : > { %p1736_p10 = pnand %p1734_p9, %p1722_p13  ;;  %p1743_p0 = por %p1742_p12, %p1741_p1 }
  0x23   : > { %p1737_p6 = pneg %p1736_p10 }
  0x25   : > { %p1744_p4 = pnand %p1743_p0, %p1737_p6 }
  0x27   : > { %1747 = shalt.err (!%p1744_p4)
}
  0x28   : > { %s1896_s25 = smov 256   ;;  %s1897_s6 = smov 16  }
  0x29   : > { %1544 = dma.hbm_to_vmem [thread:$0]  (!%p2001_p11), %s2551_s1, 4096, %s1994_s7, [#allocation7], %s1896_s25, %s1896_s25, %s1897_s6  }
  0x2a   : > { %s1748_s14 = scalar_lea.hbm %s2553_s3, 4096 }
  0x2b   : > { %p1749_p1 = scmp.ne.s32.totalorder %s2553_s3, %s1748_s14  ;;  %p1755_p10 = scmp.lt.u32.totalorder %s1748_s14, %s2553_s3 }
  0x2d   : > { %p1751_p4 = pnand %p1749_p1, %p1722_p13 }
  0x2f   : > { %p1752_p6 = pneg %p1751_p4 }
  0x31   : > { %p1757_p3 = pnand %p1755_p10, %p1752_p6 }
  0x33   : > { %1760 = shalt.err (!%p1757_p3)
}
  0x34   : > { %s1761_s7 = scalar_lea.vmem %s2005_s10, 4096  ;;  %p1769_p12 = scmp.lt.s32.totalorder %s2005_s10, %s2005_s10 }
  0x35   : > { %p1762_p5 = scmp.ne.s32.totalorder %s2005_s10, %s1761_s7  ;;  %p1770_p0 = scmp.lt.s32.totalorder %s1761_s7, %s1761_s7 }
  0x37   : > { %p1764_p7 = pnand %p1762_p5, %p1722_p13  ;;  %p1771_p1 = por %p1770_p0, %p1769_p12 }
  0x39   : > { %p1765_p9 = pneg %p1764_p7 }
  0x3b   : > { %p1772_p4 = pnand %p1771_p1, %p1765_p9 }
  0x3d   : > { %1775 = shalt.err (!%p1772_p4)
}
  0x3e   : > { %s2559_s25 = smov 128   ;;  %s2560_s6 = smov 8  }
  0x3f   : > { %1547 = dma.hbm_to_vmem [thread:$0]  (!%p2001_p11), %s2553_s3, 4096, %s2005_s10, [#allocation7], %s2559_s25, %s2559_s25, %s2560_s6  }
  0x40   : > { %s34_s12 = sadd.s32 1, %s1888_s22  ;;  %s41_s13 = sadd.s32 1, %s1880_s20 }
  0x41   : > { %p36_p13 = scmp.ge.s32.totalorder %s34_s12, 2  ;;  %p48_p6 = scmp.ne.s32.totalorder %s1880_s20, %s1876_s19 }
  0x42   : > { %p49_p10 = scmp.eq.s32.totalorder %s1892_s23, 0  ;;  %p1558_p3 = scmp.lt.s32.totalorder %s1892_s23, 2 }
  0x43   : > { %s2583_s12 = smov (%p36_p13, %s34_s12), 0  ;;  %p2072_p7 = por %p1974_p2, %p48_p6 }
  0x44   : > { %p50_p5 = por %p49_p10, %p48_p6  ;;  %s38_s14 = ssub.s32 %s1888_s22, %s2583_s12 }
  0x45   : > { %s2568_s8 = scalar_select %p2072_p7, 1, 0 }
  0x46   : > { %s246_s15 = sand.u32 1, %s1880_s20   ;;  %p39_p9 = scmp.eq.s32.totalorder %s38_s14, 0 }
  0x47   : > { %s1527_s10 = smul.u32 200, %s246_s15  ;;  %p2079_p11 = pnand %p1558_p3, %p50_p5 }
  0x48   : > { %s2084_s17 = scalar_select %p39_p9, %s1880_s20, %s41_s13  }
  0x49   : > { %s1413_s24 = smul.u32 3200, %s1888_s22  ;;  %s250_s7 = scalar_lea.vmem [#allocation3], %s1527_s10 }
  0x4a   : > { %s257_s9 = sshll.u32 %s250_s7, 4  ;;  %s2094_s14 = scalar_lea.sflag [#allocation4], %s246_s15  ;;  %s2092_s9 = int_to_ptr.vmem [resolvable:$true] %s257_s9 }
  0x4b   : > { %s2090_s25 = scalar_lea.hbm %s2550_s0, %s1413_s24  ;;  %p1778_p12 = pneg %p2079_p11 }
  0x4c   : > { %s1776_s6 = scalar_lea.hbm %s2090_s25, 3200  ;;  %s1781_s24 = scalar_lea.hbm %s2550_s0, 6400 }
  0x4d   : > { %p1777_p2 = scmp.ne.s32.totalorder %s2090_s25, %s1776_s6  ;;  %p1782_p4 = scmp.lt.u32.totalorder %s2090_s25, %s2550_s0 }
  0x4e   : > { %p1783_p13 = scmp.lt.u32.totalorder %s1781_s24, %s1776_s6  ;;  %p1785_p10 = scmp.lt.u32.totalorder %s1776_s6, %s2090_s25 }
  0x4f   : > { %p1779_p0 = pnand %p1778_p12, %p1777_p2 }
  0x50   : > { %p1784_p6 = por %p1783_p13, %p1782_p4 }
  0x51   : > { %p1780_p1 = pneg %p1779_p0 }
  0x52   : > { %p1786_p3 = por %p1785_p10, %p1784_p6 }
  0x54   : > { %p1787_p5 = pnand %p1786_p3, %p1780_p1 }
  0x56   : > { %1790 = shalt.err (!%p1787_p5)
}
  0x57   : > { %s1791_s15 = scalar_lea.vmem %s2092_s9, 3200  ;;  %s1900_s11 = smov [#allocation3]  }
  0x58   : > { %p1792_p9 = scmp.ne.s32.totalorder %s2092_s9, %s1791_s15  ;;  %s1796_s13 = sshll.u32 %s1900_s11, 4  ;;  %s1797_s13 = int_to_ptr.vmem [resolvable:$false] %s1796_s13 }
  0x59   : > { %s1798_s10 = scalar_lea.vmem %s1797_s13, 6400  ;;  %p1799_p7 = scmp.lt.s32.totalorder %s2092_s9, %s1797_s13 }
  0x5a   : > { %p1794_p2 = pnand %p1792_p9, %p1778_p12  ;;  %p1800_p4 = scmp.lt.s32.totalorder %s1798_s10, %s1791_s15 }
  0x5c   : > { %p1795_p0 = pneg %p1794_p2  ;;  %p1801_p13 = por %p1800_p4, %p1799_p7 }
  0x5e   : > { %p1802_p6 = pnand %p1801_p13, %p1795_p0 }
  0x60   : > { %1805 = shalt.err (!%p1802_p6)
}
  0x61   : > { %s2570_s6 = smov 8   ;;  %s2571_s24 = smov 128  }
  0x62   : > { %1551 = dma.hbm_to_vmem [thread:$0]  (!%p2079_p11), %s2090_s25, 3200, %s2092_s9, %s2094_s14, %s2571_s24, %s2571_s24, %s2570_s6  }
  0x63   : > { %269 = sbr.rel (%p1990_p8) target bundleno = 703 (0x2bf), region = 40  ;;  %s2128_s7 = sand.u32 (!%p1990_p8), 1, %s1876_s19  }
  0x64   : > { %s1528_s27 = smul.u32 (!%p1990_p8), 200, %s2128_s7  ;;  %s272_s15 = scalar_lea.sflag (!%p1990_p8), [#allocation4], %s2128_s7 }
  0x65   : > { %p2572_p7 = scmp.ne.s32.totalorder (!%p1990_p8), %s2564_s28, 0 }
  0x66   : > { %s2134_s16 = scalar_lea.vmem (!%p1990_p8), [#allocation3], %s1528_s27 }
  0x6a   : > { %1859 = dma.done.wait (%p2572_p7), %s272_s15, 3200  }
  0x6b   : > { %1861 = vsyncadd (%p2572_p7), %s272_s15, 4294964096  ;;  %p2573_p11 = scmp.ne.s32.totalorder %s2562_s26, 0 }
  0x6d   : > { %1863 = dma.done.wait (%p2573_p11), [#allocation7], 8192  }
  0x6e   : > { %1865 = vsyncadd (%p2573_p11), [#allocation7], 4294959104  ;;  %v1901_v0 = vmov 0.0   ;;  %v378_v1 = vld [vmem:[#allocation6 + $0x8] sm:$0xff]  ;;  %v380_v2 = vld [vmem:[#allocation6 + $0x18] sm:$0xff]  ;;  %v1902_v15 = vmov 0.0|0.0  }
  0x6f   : > { %485 = vmatprep.mubr.f32.mxu0 %v1901_v0  ;;  %v377_v3 = vld [vmem:[#allocation6] sm:$0xff]  ;;  %v1415_v4 = vpack.c.bf16 %v380_v2, %v378_v1  ;;  %v379_v5 = vld [vmem:[#allocation6 + $0x10] sm:$0xff]  ;;  %v382_v6 = vld [vmem:[#allocation6 + $0x28] sm:$0xff]  ;;  %1495 = vmatprep.subr.bf16.mxu1 %v1902_v15  ;;  %s2443_s9 = scalar_lea.vmem [#allocation9], %s1528_s27  ;;  %s1414_s14 = smul.u32 3200, %s1884_s21 }
  0x70   : > { %v384_v7 = vld [vmem:[#allocation6 + $0x38] sm:$0xff]  ;;  %v1417_v8 = vpack.c.bf16 %v379_v5, %v377_v3  ;;  %v381_v10 = vld [vmem:[#allocation6 + $0x20] sm:$0xff]  ;;  %v383_v11 = vld [vmem:[#allocation6 + $0x30] sm:$0xff]  ;;  %s1282_s11 = sshll.u32 %s2443_s9, 4  ;;  %s1269_s21 = scalar_lea.sflag [#allocation5], %s2128_s7  ;;  %s2499_s11 = int_to_ptr.vmem [resolvable:$true] %s1282_s11 }
  0x71   : > { %v1419_v9 = vpack.c.bf16 %v384_v7, %v382_v6  ;;  %v386_v12 = vld [vmem:[#allocation6 + $0x48] sm:$0xff]  ;;  %1416 = vmatprep.subr.bf16.mxu0 %v1415_v4  ;;  %v388_v13 = vld [vmem:[#allocation6 + $0x58] sm:$0xff]  ;;  %v1421_v14 = vpack.c.bf16 %v383_v11, %v381_v10  ;;  %v385_v17 = vld [vmem:[#allocation6 + $0x40] sm:$0xff]  ;;  %s2497_s6 = scalar_lea.hbm %s2555_s5, %s1414_s14  ;;  %s1806_s24 = scalar_lea.vmem %s2499_s11, 3200 }
  0x72   : > { %1418 = vmatpush1.bf16.msra.mxu0 %v1417_v8  ;;  %v1423_v16 = vpack.c.bf16 %v388_v13, %v386_v12  ;;  %v387_v18 = vld [vmem:[#allocation6 + $0x50] sm:$0xff]  ;;  %v390_v19 = vld [vmem:[#allocation6 + $0x68] sm:$0xff]  ;;  %v392_v20 = vld [vmem:[#allocation6 + $0x78] sm:$0xff]  ;;  %p1807_p8 = scmp.ne.s32.totalorder %s2499_s11, %s1806_s24  ;;  %p2574_p12 = scmp.ne.s32.totalorder %s2568_s8, 0 }
  0x73   : > { %1420 = vmatprep.subr.bf16.mxu0 %v1419_v9  ;;  %v1425_v21 = vpack.c.bf16 %v387_v18, %v385_v17  ;;  %v1427_v22 = vpack.c.bf16 %v392_v20, %v390_v19  ;;  %v389_v23 = vld [vmem:[#allocation6 + $0x60] sm:$0xff]  ;;  %v391_v24 = vld [vmem:[#allocation6 + $0x70] sm:$0xff]  ;;  %v394_v25 = vld [vmem:[#allocation6 + $0x88] sm:$0xff]  ;;  %s1903_s27 = smov [#allocation9]  }
  0x74   : > { %v396_v26 = vld [vmem:[#allocation6 + $0x98] sm:$0xff]  ;;  %v1429_v27 = vpack.c.bf16 %v391_v24, %v389_v23  ;;  %v393_v29 = vld [vmem:[#allocation6 + $0x80] sm:$0xff]  ;;  %v395_v30 = vld [vmem:[#allocation6 + $0x90] sm:$0xff]  ;;  %p1808_p1 = pnand %p1807_p8, %p2574_p12  ;;  %s1810_s15 = sshll.u32 %s1903_s27, 4  ;;  %s1811_s15 = int_to_ptr.vmem [resolvable:$false] %s1810_s15 }
  0x75   : > { %v1431_v28 = vpack.c.bf16 %v396_v26, %v394_v25  ;;  %v398_v31 = vld [vmem:[#allocation6 + $0xa8] sm:$0xff]  ;;  %v400_v32 = vld [vmem:[#allocation6 + $0xb8] sm:$0xff]  ;;  %v1433_v33 = vpack.c.bf16 %v395_v30, %v393_v29  ;;  %v397_v35 = vld [vmem:[#allocation6 + $0xa0] sm:$0xff]  ;;  %p1813_p3 = scmp.lt.s32.totalorder %s2499_s11, %s1811_s15 }
  0x76   : > { %1422 = vmatpush1.bf16.msra.mxu0 %v1421_v14  ;;  %v1435_v34 = vpack.c.bf16 %v400_v32, %v398_v31  ;;  %v399_v36 = vld [vmem:[#allocation6 + $0xb0] sm:$0xff]  ;;  %v402_v37 = vld [vmem:[#allocation6 + $0xc8] sm:$0xff]  ;;  %v404_v38 = vld [vmem:[#allocation6 + $0xd8] sm:$0xff]  ;;  %p1809_p10 = pneg %p1808_p1 }
  0x77   : > { %1424 = vmatprep.subr.bf16.mxu0 %v1423_v16  ;;  %v911_v39 = vld [vmem:[#allocation8] sm:$0xff]  ;;  %v912_v40 = vld [vmem:[#allocation8 + $0x8] sm:$0xff]  ;;  %v1437_v41 = vpack.c.bf16 %v399_v36, %v397_v35  ;;  %v1439_v44 = vpack.c.bf16 %v404_v38, %v402_v37  ;;  %v403_v45 = vld [vmem:[#allocation6 + $0xd0] sm:$0xff] }
  0x78   : > { %v401_v42 = vld [vmem:[#allocation6 + $0xc0] sm:$0xff]  ;;  %v1448_v43 = vpack.c.bf16 %v912_v40, %v911_v39  ;;  %v913_v46 = vld [vmem:[#allocation8 + $0x10] sm:$0xff]  ;;  %v914_v47 = vld [vmem:[#allocation8 + $0x18] sm:$0xff] }
  0x79   : > { %v406_v48 = vld [vmem:[#allocation6 + $0xe8] sm:$0xff]  ;;  %v408_v49 = vld [vmem:[#allocation6 + $0xf8] sm:$0xff]  ;;  %v1441_v50 = vpack.c.bf16 %v403_v45, %v401_v42  ;;  %v405_v51 = vld [vmem:[#allocation6 + $0xe0] sm:$0xff]  ;;  %v1451_v52 = vpack.c.bf16 %v914_v47, %v913_v46 }
  0x7a   : > { %1426 = vmatpush1.bf16.msra.mxu0 %v1425_v21  ;;  %1511 = vmatpush1.bf16.msra.mxu1 %v1448_v43  ;;  %v1443_v53 = vpack.c.bf16 %v408_v49, %v406_v48  ;;  %v407_v54 = vld [vmem:[#allocation6 + $0xf0] sm:$0xff]  ;;  %v915_v55 = vld [vmem:[#allocation8 + $0x20] sm:$0xff]  ;;  %v916_v56 = vld [vmem:[#allocation8 + $0x28] sm:$0xff] }
  0x7b   : > { %1428 = vmatprep.subr.bf16.mxu0 %v1427_v22  ;;  %1496 = vmatprep.subr.bf16.mxu1 %v1902_v15  ;;  %v1445_v57 = vpack.c.bf16 %v407_v54, %v405_v51  ;;  %v1454_v58 = vpack.c.bf16 %v916_v56, %v915_v55  ;;  %v917_v59 = vld [vmem:[#allocation8 + $0x30] sm:$0xff]  ;;  %v918_v60 = vld [vmem:[#allocation8 + $0x38] sm:$0xff]  ;;  %v919_v63 = vld [vmem:[#allocation8 + $0x40] sm:$0xff] }
  0x7c   : > { %v352_v61 = vld [vmem:[%s2134_s16] sm:$0xff]  ;;  %v1457_v62 = vpack.c.bf16 %v918_v60, %v917_v59  ;;  %v920_v1 = vld [vmem:[#allocation8 + $0x48] sm:$0xff]  ;;  %v353_v2 = vld [vmem:[%s2134_s16 + $0x8] sm:$0xff]  ;;  %v411_v60 = vlaneseq }
  0x7d   : > { %v1460_v3 = vpack.c.bf16 %v920_v1, %v919_v63  ;;  %v921_v4 = vld [vmem:[#allocation8 + $0x50] sm:$0xff]  ;;  %v922_v5 = vld [vmem:[#allocation8 + $0x58] sm:$0xff]  ;;  %v354_v6 = vld [vmem:[%s2134_s16 + $0x10] sm:$0xff] }
  0x7e   : > { %1430 = vmatpush1.bf16.msra.mxu0 %v1429_v27  ;;  %1512 = vmatpush1.bf16.msra.mxu1 %v1451_v52  ;;  %v1463_v7 = vpack.c.bf16 %v922_v5, %v921_v4  ;;  %v923_v8 = vld [vmem:[#allocation8 + $0x60] sm:$0xff]  ;;  %v924_v9 = vld [vmem:[#allocation8 + $0x68] sm:$0xff]  ;;  %v925_v12 = vld [vmem:[#allocation8 + $0x70] sm:$0xff] }
  0x7f   : > { %1432 = vmatprep.subr.bf16.mxu0 %v1431_v28  ;;  %1497 = vmatprep.subr.bf16.mxu1 %v1902_v15  ;;  %v355_v10 = vld [vmem:[%s2134_s16 + $0x18] sm:$0xff]  ;;  %v1466_v11 = vpack.c.bf16 %v924_v9, %v923_v8  ;;  %v926_v13 = vld [vmem:[#allocation8 + $0x78] sm:$0xff]  ;;  %v927_v17 = vld [vmem:[#allocation8 + $0x80] sm:$0xff] }
  0x80   : > { %v356_v14 = vld [vmem:[%s2134_s16 + $0x20] sm:$0xff]  ;;  %v1469_v16 = vpack.c.bf16 %v926_v13, %v925_v12  ;;  %v928_v18 = vld [vmem:[#allocation8 + $0x88] sm:$0xff]  ;;  %v357_v19 = vld [vmem:[%s2134_s16 + $0x28] sm:$0xff] }
  0x81   : > { %v1472_v20 = vpack.c.bf16 %v928_v18, %v927_v17  ;;  %v929_v21 = vld [vmem:[#allocation8 + $0x90] sm:$0xff]  ;;  %v930_v22 = vld [vmem:[#allocation8 + $0x98] sm:$0xff]  ;;  %v358_v23 = vld [vmem:[%s2134_s16 + $0x30] sm:$0xff] }
  0x82   : > { %1434 = vmatpush1.bf16.msra.mxu0 %v1433_v33  ;;  %1513 = vmatpush1.bf16.msra.mxu1 %v1454_v58  ;;  %v1475_v24 = vpack.c.bf16 %v930_v22, %v929_v21  ;;  %v931_v25 = vld [vmem:[#allocation8 + $0xa0] sm:$0xff]  ;;  %v932_v26 = vld [vmem:[#allocation8 + $0xa8] sm:$0xff]  ;;  %v360_v29 = vld [vmem:[%s2134_s16 + $0x40] sm:$0xff] }
  0x83   : > { %1436 = vmatprep.subr.bf16.mxu0 %v1435_v34  ;;  %1498 = vmatprep.subr.bf16.mxu1 %v1902_v15  ;;  %v359_v27 = vld [vmem:[%s2134_s16 + $0x38] sm:$0xff]  ;;  %v1478_v28 = vpack.c.bf16 %v932_v26, %v931_v25  ;;  %v361_v30 = vld [vmem:[%s2134_s16 + $0x48] sm:$0xff]  ;;  %v362_v31 = vld [vmem:[%s2134_s16 + $0x50] sm:$0xff] }
  0x84   : > { %v363_v32 = vld [vmem:[%s2134_s16 + $0x58] sm:$0xff]  ;;  %v364_v33 = vld [vmem:[%s2134_s16 + $0x60] sm:$0xff]  ;;  %v365_v34 = vld [vmem:[%s2134_s16 + $0x68] sm:$0xff] }
  0x85   : > { %v366_v35 = vld [vmem:[%s2134_s16 + $0x70] sm:$0xff]  ;;  %v367_v36 = vld [vmem:[%s2134_s16 + $0x78] sm:$0xff]  ;;  %v368_v37 = vld [vmem:[%s2134_s16 + $0x80] sm:$0xff] }
  0x86   : > { %1438 = vmatpush1.bf16.msra.mxu0 %v1437_v41  ;;  %1514 = vmatpush1.bf16.msra.mxu1 %v1457_v62  ;;  %v369_v38 = vld [vmem:[%s2134_s16 + $0x88] sm:$0xff]  ;;  %v370_v39 = vld [vmem:[%s2134_s16 + $0x90] sm:$0xff]  ;;  %v371_v40 = vld [vmem:[%s2134_s16 + $0x98] sm:$0xff] }
  0x87   : > { %1440 = vmatprep.subr.bf16.mxu0 %v1439_v44  ;;  %1499 = vmatprep.subr.bf16.mxu1 %v1902_v15  ;;  %v372_v41 = vld [vmem:[%s2134_s16 + $0xa0] sm:$0xff]  ;;  %v373_v42 = vld [vmem:[%s2134_s16 + $0xa8] sm:$0xff]  ;;  %v374_v46 = vld [vmem:[%s2134_s16 + $0xb0] sm:$0xff] }
  0x88   : > { %v934_v44 = vld [vmem:[#allocation8 + $0xb8] sm:$0xff]  ;;  %v935_v47 = vld [vmem:[#allocation8 + $0xc0] sm:$0xff]  ;;  %v936_v48 = vld [vmem:[#allocation8 + $0xc8] sm:$0xff] }
  0x89   : > { %v1484_v49 = vpack.c.bf16 %v936_v48, %v935_v47  ;;  %v937_v51 = vld [vmem:[#allocation8 + $0xd0] sm:$0xff]  ;;  %v939_v55 = vld [vmem:[#allocation8 + $0xe0] sm:$0xff]  ;;  %v940_v56 = vld [vmem:[#allocation8 + $0xe8] sm:$0xff] }
  0x8a   : > { %1442 = vmatpush1.bf16.msra.mxu0 %v1441_v50  ;;  %1515 = vmatpush1.bf16.msra.mxu1 %v1460_v3  ;;  %v375_v50 = vld [vmem:[%s2134_s16 + $0xb8] sm:$0xff]  ;;  %v376_v54 = vld [vmem:[%s2134_s16 + $0xc0] sm:$0xff]  ;;  %s1812_s16 = scalar_lea.vmem %s1811_s15, 6400 }
  0x8b   : > { %1444 = vmatprep.subr.bf16.mxu0 %v1443_v53  ;;  %1500 = vmatprep.subr.bf16.mxu1 %v1902_v15  ;;  %v942_v59 = vld [vmem:[#allocation8 + $0xf8] sm:$0xff]  ;;  %v409_v63 = vld [vmem:[%s2552_s2] sm:$0x3]  ;;  %p1814_p5 = scmp.lt.s32.totalorder %s1812_s16, %s1806_s24 }
  0x8d   : > { %p1815_p9 = por %p1814_p5, %p1813_p3 }
  0x8e   : > { %1446 = vmatpush1.bf16.msra.mxu0 %v1445_v57  ;;  %1516 = vmatpush1.bf16.msra.mxu1 %v1463_v7  ;;  %v1490_v57 = vpack.c.bf16 %v940_v56, %v939_v55 }
  0x8f   : > { %1447 = vmatprep.subr.bf16.mxu0 %v1902_v15  ;;  %1501 = vmatprep.subr.bf16.mxu1 %v1902_v15  ;;  %p1816_p2 = pnand %p1815_p9, %p1809_p10 }
  0x91   : > { %486 = vmatmul.mubr.f32.vlgmr.msra.gmra.mrb[0].mxu0 %v352_v61  ;;  %v412_v61 = vshrl.u32 %v411_v60, 7 }
  0x92   : > { %491 = vmatprep.mubr.f32.mxu0 %v1901_v0  ;;  %1449 = vmatpush1.bf16.msra.mxu0 %v1448_v43  ;;  %v933_v43 = vld [vmem:[#allocation8 + $0xb0] sm:$0xff] }
  0x93   : > { %1450 = vmatprep.subr.bf16.mxu0 %v1902_v15  ;;  %1517 = vmatpush1.bf16.msra.mxu1 %v1466_v11  ;;  %v1481_v45 = vpack.c.bf16 %v934_v44, %v933_v43  ;;  %v417_v1 = vsub.s32 1, %v412_v61 }
  0x94   : > { %1502 = vmatprep.subr.bf16.mxu1 %v1902_v15 }
  0x95   : > { %492 = vmatmul.mubr.f32.gmra.mrb[2].mxu0 %v353_v2 }
  0x96   : > { %497 = vmatprep.mubr.f32.mxu0 %v1901_v0  ;;  %1452 = vmatpush1.bf16.msra.mxu0 %v1451_v52  ;;  %v938_v52 = vld [vmem:[#allocation8 + $0xd8] sm:$0xff] }
  0x97   : > { %1453 = vmatprep.subr.bf16.mxu0 %v1902_v15  ;;  %1518 = vmatpush1.bf16.msra.mxu1 %v1469_v16  ;;  %v1487_v53 = vpack.c.bf16 %v938_v52, %v937_v51 }
  0x98   : > { %1503 = vmatprep.subr.bf16.mxu1 %v1902_v15 }
  0x99   : > { %498 = vmatmul.mubr.f32.gmra.mrb[4].mxu0 %v354_v6 }
  0x9a   : > { %503 = vmatprep.mubr.f32.mxu0 %v1901_v0  ;;  %1455 = vmatpush1.bf16.msra.mxu0 %v1454_v58  ;;  %v941_v58 = vld [vmem:[#allocation8 + $0xf0] sm:$0xff] }
  0x9b   : > { %1456 = vmatprep.subr.bf16.mxu0 %v1902_v15  ;;  %1519 = vmatpush1.bf16.msra.mxu1 %v1472_v20 }
  0x9c   : > { %1504 = vmatprep.subr.bf16.mxu1 %v1902_v15 }
  0x9d   : > { %504 = vmatmul.mubr.f32.gmra.mrb[6].mxu0 %v355_v10 }
  0x9e   : > { %509 = vmatprep.mubr.f32.mxu0 %v1901_v0  ;;  %1458 = vmatpush1.bf16.msra.mxu0 %v1457_v62  ;;  %v413_v62 = vsub.s32 0, %v412_v61 }
  0x9f   : > { %1459 = vmatprep.subr.bf16.mxu0 %v1902_v15  ;;  %1520 = vmatpush1.bf16.msra.mxu1 %v1475_v24 }
  0xa0   : > { %1505 = vmatprep.subr.bf16.mxu1 %v1902_v15  ;;  %v2229_v2 = vrot.slane %v409_v63, %v413_v62 }
  0xa1   : > { %510 = vmatmul.mubr.f32.gmra.mrb[8].mxu0 %v356_v14 }
  0xa2   : > { %515 = vmatprep.mubr.f32.mxu0 %v1901_v0  ;;  %1461 = vmatpush1.bf16.msra.mxu0 %v1460_v3  ;;  %v2231_v3 = vrot.slane %v409_v63, %v417_v1 }
  0xa3   : > { %1462 = vmatprep.subr.bf16.mxu0 %v1902_v15  ;;  %1521 = vmatpush1.bf16.msra.mxu1 %v1478_v28 }
  0xa4   : > { %1506 = vmatprep.subr.bf16.mxu1 %v1902_v15 }
  0xa5   : > { %516 = vmatmul.mubr.f32.gmra.mrb[10].mxu0 %v357_v19 }
  0xa6   : > { %521 = vmatprep.mubr.f32.mxu0 %v1901_v0  ;;  %1464 = vmatpush1.bf16.msra.mxu0 %v1463_v7 }
  0xa7   : > { %1465 = vmatprep.subr.bf16.mxu0 %v1902_v15  ;;  %1522 = vmatpush1.bf16.msra.mxu1 %v1481_v45 }
  0xa8   : > { %1507 = vmatprep.subr.bf16.mxu1 %v1902_v15 }
  0xa9   : > { %522 = vmatmul.mubr.f32.gmra.mrb[12].mxu0 %v358_v23 }
  0xaa   : > { %527 = vmatprep.mubr.f32.mxu0 %v1901_v0  ;;  %1467 = vmatpush1.bf16.msra.mxu0 %v1466_v11 }
  0xab   : > { %1468 = vmatprep.subr.bf16.mxu0 %v1902_v15  ;;  %1523 = vmatpush1.bf16.msra.mxu1 %v1484_v49 }
  0xac   : > { %1508 = vmatprep.subr.bf16.mxu1 %v1902_v15 }
  0xad   : > { %528 = vmatmul.mubr.f32.gmra.mrb[14].mxu0 %v359_v27 }
  0xae   : > { %533 = vmatprep.mubr.f32.mxu0 %v1901_v0  ;;  %1470 = vmatpush1.bf16.msra.mxu0 %v1469_v16 }
  0xaf   : > { %1471 = vmatprep.subr.bf16.mxu0 %v1902_v15  ;;  %1524 = vmatpush1.bf16.msra.mxu1 %v1487_v53 }
  0xb0   : > { %1509 = vmatprep.subr.bf16.mxu1 %v1902_v15 }
  0xb1   : > { %534 = vmatmul.mubr.f32.gmra.mrb[16].mxu0 %v360_v29 }
  0xb2   : > { %539 = vmatprep.mubr.f32.mxu0 %v1901_v0  ;;  %1473 = vmatpush1.bf16.msra.mxu0 %v1472_v20 }
  0xb3   : > { %1474 = vmatprep.subr.bf16.mxu0 %v1902_v15  ;;  %1525 = vmatpush1.bf16.msra.mxu1 %v1490_v57 }
  0xb4   : > { %1510 = vmatprep.subr.bf16.mxu1 %v1902_v15 }
  0xb5   : > { %540 = vmatmul.mubr.f32.gmra.mrb[18].mxu0 %v361_v30 }
  0xb6   : > { %545 = vmatprep.mubr.f32.mxu0 %v1901_v0  ;;  %1476 = vmatpush1.bf16.msra.mxu0 %v1475_v24 }
  0xb7   : > { %1477 = vmatprep.subr.bf16.mxu0 %v1902_v15 }
  0xb9   : > { %546 = vmatmul.mubr.f32.gmra.mrb[20].mxu0 %v362_v31 }
  0xba   : > { %551 = vmatprep.mubr.f32.mxu0 %v1901_v0  ;;  %1479 = vmatpush1.bf16.msra.mxu0 %v1478_v28 }
  0xbb   : > { %1480 = vmatprep.subr.bf16.mxu0 %v1902_v15 }
  0xbd   : > { %552 = vmatmul.mubr.f32.gmra.mrb[22].mxu0 %v363_v32 }
  0xbe   : > { %557 = vmatprep.mubr.f32.mxu0 %v1901_v0  ;;  %1482 = vmatpush1.bf16.msra.mxu0 %v1481_v45 }
  0xbf   : > { %1483 = vmatprep.subr.bf16.mxu0 %v1902_v15 }
  0xc1   : > { %558 = vmatmul.mubr.f32.gmra.mrb[24].mxu0 %v364_v33 }
  0xc2   : > { %563 = vmatprep.mubr.f32.mxu0 %v1901_v0  ;;  %1485 = vmatpush1.bf16.msra.mxu0 %v1484_v49 }
  0xc3   : > { %1486 = vmatprep.subr.bf16.mxu0 %v1902_v15 }
  0xc5   : > { %564 = vmatmul.mubr.f32.gmra.mrb[26].mxu0 %v365_v34 }
  0xc6   : > { %569 = vmatprep.mubr.f32.mxu0 %v1901_v0  ;;  %1488 = vmatpush1.bf16.msra.mxu0 %v1487_v53 }
  0xc7   : > { %1489 = vmatprep.subr.bf16.mxu0 %v1902_v15 }
  0xc9   : > { %570 = vmatmul.mubr.f32.gmra.mrb[28].mxu0 %v366_v35 }
  0xca   : > { %575 = vmatprep.mubr.f32.mxu0 %v1901_v0  ;;  %1491 = vmatpush1.bf16.msra.mxu0 %v1490_v57 }
  0xcb   : > { %1492 = vmatprep.subr.bf16.mxu0 %v1902_v15 }
  0xcd   : > { %576 = vmatmul.mubr.f32.gmra.mrb[30].mxu0 %v367_v36 }
  0xce   : > { %581 = vmatprep.mubr.f32.mxu0 %v1901_v0 }
  0xd1   : > { %582 = vmatmul.mubr.f32.gmra.mrb[32].mxu0 %v368_v37 }
  0xd2   : > { %587 = vmatprep.mubr.f32.mxu0 %v1901_v0 }
  0xd5   : > { %588 = vmatmul.mubr.f32.gmra.mrb[34].mxu0 %v369_v38 }
  0xd6   : > { %593 = vmatprep.mubr.f32.mxu0 %v1901_v0 }
  0xd9   : > { %594 = vmatmul.mubr.f32.gmra.mrb[36].mxu0 %v370_v39 }
  0xda   : > { %599 = vmatprep.mubr.f32.mxu0 %v1901_v0 }
  0xdd   : > { %600 = vmatmul.mubr.f32.gmra.mrb[38].mxu0 %v371_v40 }
  0xde   : > { %605 = vmatprep.mubr.f32.mxu0 %v1901_v0 }
  0xe1   : > { %606 = vmatmul.mubr.f32.gmra.mrb[40].mxu0 %v372_v41 }
  0xe2   : > { %611 = vmatprep.mubr.f32.mxu0 %v1901_v0 }
  0xe5   : > { %612 = vmatmul.mubr.f32.gmra.mrb[42].mxu0 %v373_v42 }
  0xe6   : > { %617 = vmatprep.mubr.f32.mxu0 %v1901_v0 }
  0xe9   : > { %618 = vmatmul.mubr.f32.gmra.mrb[44].mxu0 %v374_v46 }
  0xea   : > { %623 = vmatprep.mubr.f32.mxu0 %v1901_v0 }
  0xed   : > { %624 = vmatmul.mubr.f32.gmra.mrb[46].mxu0 %v375_v50 }
  0xee   : > { %629 = vmatprep.mubr.f32.mxu0 %v1901_v0  ;;  %v1493_v0 = vpack.c.bf16 %v942_v59, %v941_v58 }
  0xf0   : > { %1494 = vmatpush1.bf16.msra.mxu0 %v1493_v0  ;;  %1526 = vmatpush1.bf16.msra.mxu1 %v1493_v0 }
  0xf1   : > { %630 = vmatmul.mubr.f32.gmra.mrb[48].mxu0 %v376_v54 }
 0x164   : > { %v487_v4 = vpop.f32.mrb[0].mxu0 }
 0x165   : > { %v488_v5 = vadd.f32 %v487_v4, %v2229_v2  ;;  %v489_v6 = vpop.f32.mrb[1].mxu0 }
 0x166   : > { %v490_v15 = vadd.f32 %v489_v6, %v2231_v3 }
 0x167   : > { %v686_v7 = vmul.f32 0.70710677, %v488_v5  ;;  %v636_v36 = vmul.f32 0.5, %v488_v5 }
 0x168   : > { %v687_v8 = vmul.f32 0.70710677, %v490_v15  ;;  %v493_v9 = vpop.f32.mrb[2].mxu0  ;;  %v637_v32 = vmul.f32 0.5, %v490_v15 }
 0x169   : > { %1620 = verf.f32 %v686_v7  ;;  %v494_v10 = vadd.f32 %v493_v9, %v2229_v2  ;;  %v495_v11 = vpop.f32.mrb[3].mxu0 }
 0x16a   : > { %1622 = verf.f32 %v687_v8  ;;  %v496_v12 = vadd.f32 %v495_v11, %v2231_v3 }
 0x16b   : > { %v688_v13 = vmul.f32 0.70710677, %v494_v10  ;;  %v638_v50 = vmul.f32 0.5, %v494_v10 }
 0x16c   : > { %v689_v14 = vmul.f32 0.70710677, %v496_v12  ;;  %v499_v16 = vpop.f32.mrb[4].mxu0  ;;  %v639_v46 = vmul.f32 0.5, %v496_v12 }
 0x16d   : > { %1624 = verf.f32 %v688_v13  ;;  %v500_v17 = vadd.f32 %v499_v16, %v2229_v2  ;;  %v501_v18 = vpop.f32.mrb[5].mxu0 }
 0x16e   : > { %1626 = verf.f32 %v689_v14  ;;  %v502_v19 = vadd.f32 %v501_v18, %v2231_v3 }
 0x16f   : > { %v690_v20 = vmul.f32 0.70710677, %v500_v17  ;;  %v640_v63 = vmul.f32 0.5, %v500_v17 }
 0x170   : > { %v691_v21 = vmul.f32 0.70710677, %v502_v19  ;;  %v505_v22 = vpop.f32.mrb[6].mxu0  ;;  %v641_v0 = vmul.f32 0.5, %v502_v19 }
 0x171   : > { %1628 = verf.f32 %v690_v20  ;;  %v2240_v23 = vadd.f32 %v505_v22, %v2229_v2  ;;  %v507_v24 = vpop.f32.mrb[7].mxu0 }
 0x172   : > { %1630 = verf.f32 %v691_v21  ;;  %v508_v25 = vadd.f32 %v507_v24, %v2231_v3 }
 0x173   : > { %v1621_v26 = vpop.eup %1620  ;;  %v692_v27 = vmul.f32 0.70710677, %v2240_v23  ;;  %v642_v16 = vmul.f32 0.5, %v2240_v23 }
 0x174   : > { %v1623_v28 = vpop.eup %1622  ;;  %v786_v29 = vadd.f32 1.0, %v1621_v26  ;;  %v693_v30 = vmul.f32 0.70710677, %v508_v25  ;;  %v511_v31 = vpop.f32.mrb[8].mxu0  ;;  %v643_v11 = vmul.f32 0.5, %v508_v25 }
 0x175   : > { %v787_v33 = vadd.f32 1.0, %v1623_v28  ;;  %1632 = verf.f32 %v692_v27  ;;  %v2245_v34 = vadd.f32 %v511_v31, %v2229_v2  ;;  %v513_v35 = vpop.f32.mrb[9].mxu0 }
 0x176   : > { %1634 = verf.f32 %v693_v30  ;;  %v2248_v37 = vadd.f32 %v513_v35, %v2231_v3  ;;  %v836_v42 = vmul.f32 %v786_v29, %v636_v36 }
 0x177   : > { %v1625_v38 = vpop.eup %1624  ;;  %v694_v39 = vmul.f32 0.70710677, %v2245_v34  ;;  %v837_v40 = vmul.f32 %v787_v33, %v637_v32  ;;  %v644_v30 = vmul.f32 0.5, %v2245_v34 }
 0x178   : > { %v1627_v41 = vpop.eup %1626  ;;  %v788_v43 = vadd.f32 1.0, %v1625_v38  ;;  %v695_v44 = vmul.f32 0.70710677, %v2248_v37  ;;  %v517_v45 = vpop.f32.mrb[10].mxu0  ;;  %v645_v28 = vmul.f32 0.5, %v2248_v37 }
 0x179   : > { %v789_v47 = vadd.f32 1.0, %v1627_v41  ;;  %1636 = verf.f32 %v694_v39  ;;  %v2253_v48 = vadd.f32 %v517_v45, %v2229_v2  ;;  %v519_v49 = vpop.f32.mrb[11].mxu0  ;;  %1007 = vmatprep.mubr.f32.mxu0 %v837_v40 }
 0x17a   : > { %1638 = verf.f32 %v695_v44  ;;  %v2256_v51 = vadd.f32 %v519_v49, %v2231_v3  ;;  %1008 = vmatmul.mubr.f32.vlgmr.msra.gmra.mrb[50].mxu0 %v836_v42  ;;  %v838_v59 = vmul.f32 %v788_v43, %v638_v50 }
 0x17b   : > { %v1629_v52 = vpop.eup %1628  ;;  %v696_v53 = vmul.f32 0.70710677, %v2253_v48  ;;  %v839_v54 = vmul.f32 %v789_v47, %v639_v46  ;;  %v646_v44 = vmul.f32 0.5, %v2253_v48 }
 0x17c   : > { %v1631_v55 = vpop.eup %1630  ;;  %v790_v56 = vadd.f32 1.0, %v1629_v52  ;;  %v697_v57 = vmul.f32 0.70710677, %v2256_v51  ;;  %v523_v58 = vpop.f32.mrb[12].mxu0  ;;  %v647_v37 = vmul.f32 0.5, %v2256_v51 }
 0x17d   : > { %v791_v60 = vadd.f32 1.0, %v1631_v55  ;;  %1640 = verf.f32 %v696_v53  ;;  %v2261_v61 = vadd.f32 %v523_v58, %v2229_v2  ;;  %v525_v62 = vpop.f32.mrb[13].mxu0  ;;  %1012 = vmatprep.mubr.f32.mxu0 %v839_v54 }
 0x17e   : > { %1642 = verf.f32 %v697_v57  ;;  %v2264_v1 = vadd.f32 %v525_v62, %v2231_v3  ;;  %1013 = vmatmul.mubr.f32.gmra.mrb[52].mxu0 %v838_v59  ;;  %v840_v10 = vmul.f32 %v790_v56, %v640_v63 }
 0x17f   : > { %v1633_v4 = vpop.eup %1632  ;;  %v698_v5 = vmul.f32 0.70710677, %v2261_v61  ;;  %v841_v6 = vmul.f32 %v791_v60, %v641_v0  ;;  %v648_v58 = vmul.f32 0.5, %v2261_v61 }
 0x180   : > { %v1635_v15 = vpop.eup %1634  ;;  %v792_v7 = vadd.f32 1.0, %v1633_v4  ;;  %v699_v8 = vmul.f32 0.70710677, %v2264_v1  ;;  %v529_v9 = vpop.f32.mrb[14].mxu0  ;;  %v649_v55 = vmul.f32 0.5, %v2264_v1 }
 0x181   : > { %v793_v12 = vadd.f32 1.0, %v1635_v15  ;;  %1644 = verf.f32 %v698_v5  ;;  %v2269_v13 = vadd.f32 %v529_v9, %v2229_v2  ;;  %v531_v14 = vpop.f32.mrb[15].mxu0  ;;  %1017 = vmatprep.mubr.f32.mxu0 %v841_v6 }
 0x182   : > { %1646 = verf.f32 %v699_v8  ;;  %v2273_v17 = vadd.f32 %v531_v14, %v2231_v3  ;;  %1018 = vmatmul.mubr.f32.gmra.mrb[54].mxu0 %v840_v10  ;;  %v842_v26 = vmul.f32 %v792_v7, %v642_v16 }
 0x183   : > { %v1637_v18 = vpop.eup %1636  ;;  %v700_v19 = vmul.f32 0.70710677, %v2269_v13  ;;  %v843_v20 = vmul.f32 %v793_v12, %v643_v11  ;;  %v650_v9 = vmul.f32 0.5, %v2269_v13 }
 0x184   : > { %v1639_v21 = vpop.eup %1638  ;;  %v794_v22 = vadd.f32 1.0, %v1637_v18  ;;  %v701_v24 = vmul.f32 0.70710677, %v2273_v17  ;;  %v535_v25 = vpop.f32.mrb[16].mxu0  ;;  %v651_v15 = vmul.f32 0.5, %v2273_v17 }
 0x185   : > { %1648 = verf.f32 %v700_v19  ;;  %v2278_v27 = vadd.f32 %v535_v25, %v2229_v2  ;;  %v537_v23 = vpop.f32.mrb[17].mxu0  ;;  %1022 = vmatprep.mubr.f32.mxu0 %v843_v20  ;;  %v795_v29 = vadd.f32 1.0, %v1639_v21 }
 0x186   : > { %1650 = verf.f32 %v701_v24  ;;  %v2283_v31 = vadd.f32 %v537_v23, %v2231_v3  ;;  %1023 = vmatmul.mubr.f32.gmra.mrb[56].mxu0 %v842_v26  ;;  %v844_v41 = vmul.f32 %v794_v22, %v644_v30 }
 0x187   : > { %v1641_v32 = vpop.eup %1640  ;;  %v702_v33 = vmul.f32 0.70710677, %v2278_v27  ;;  %v845_v35 = vmul.f32 %v795_v29, %v645_v28  ;;  %v652_v25 = vmul.f32 0.5, %v2278_v27 }
 0x188   : > { %v1643_v36 = vpop.eup %1642  ;;  %v796_v38 = vadd.f32 1.0, %v1641_v32  ;;  %v703_v39 = vmul.f32 0.70710677, %v2283_v31  ;;  %v541_v40 = vpop.f32.mrb[18].mxu0  ;;  %v653_v21 = vmul.f32 0.5, %v2283_v31 }
 0x189   : > { %v797_v42 = vadd.f32 1.0, %v1643_v36  ;;  %1652 = verf.f32 %v702_v33  ;;  %v2289_v34 = vadd.f32 %v541_v40, %v2229_v2  ;;  %v543_v43 = vpop.f32.mrb[19].mxu0  ;;  %1027 = vmatprep.mubr.f32.mxu1 %v845_v35 }
 0x18a   : > { %1654 = verf.f32 %v703_v39  ;;  %v2293_v45 = vadd.f32 %v543_v43, %v2231_v3  ;;  %1028 = vmatmul.mubr.f32.vlgmr.msra.gmra.mrb[0].mxu1 %v844_v41  ;;  %v846_v54 = vmul.f32 %v796_v38, %v646_v44 }
 0x18b   : > { %v1645_v46 = vpop.eup %1644  ;;  %v704_v47 = vmul.f32 0.70710677, %v2289_v34  ;;  %v847_v49 = vmul.f32 %v797_v42, %v647_v37  ;;  %v654_v40 = vmul.f32 0.5, %v2289_v34 }
 0x18c   : > { %v1647_v50 = vpop.eup %1646  ;;  %v798_v51 = vadd.f32 1.0, %v1645_v46  ;;  %v705_v52 = vmul.f32 0.70710677, %v2293_v45  ;;  %v547_v53 = vpop.f32.mrb[20].mxu0  ;;  %v655_v36 = vmul.f32 0.5, %v2293_v45 }
 0x18d   : > { %v799_v56 = vadd.f32 1.0, %v1647_v50  ;;  %1656 = verf.f32 %v704_v47  ;;  %v2299_v48 = vadd.f32 %v547_v53, %v2229_v2  ;;  %v549_v57 = vpop.f32.mrb[21].mxu0  ;;  %1032 = vmatprep.mubr.f32.mxu1 %v847_v49 }
 0x18e   : > { %1658 = verf.f32 %v705_v52  ;;  %v2303_v59 = vadd.f32 %v549_v57, %v2231_v3  ;;  %1033 = vmatmul.mubr.f32.gmra.mrb[2].mxu1 %v846_v54  ;;  %v848_v6 = vmul.f32 %v798_v51, %v648_v58 }
 0x18f   : > { %v1649_v0 = vpop.eup %1648  ;;  %v706_v60 = vmul.f32 0.70710677, %v2299_v48  ;;  %v849_v62 = vmul.f32 %v799_v56, %v649_v55  ;;  %v656_v53 = vmul.f32 0.5, %v2299_v48 }
 0x190   : > { %v1651_v63 = vpop.eup %1650  ;;  %v800_v1 = vadd.f32 1.0, %v1649_v0  ;;  %v707_v4 = vmul.f32 0.70710677, %v2303_v59  ;;  %v553_v5 = vpop.f32.mrb[22].mxu0  ;;  %v657_v50 = vmul.f32 0.5, %v2303_v59 }
 0x191   : > { %v801_v7 = vadd.f32 1.0, %v1651_v63  ;;  %1660 = verf.f32 %v706_v60  ;;  %v2309_v61 = vadd.f32 %v553_v5, %v2229_v2  ;;  %v555_v8 = vpop.f32.mrb[23].mxu0  ;;  %1037 = vmatprep.mubr.f32.mxu1 %v849_v62 }
 0x192   : > { %1662 = verf.f32 %v707_v4  ;;  %v2313_v10 = vadd.f32 %v555_v8, %v2231_v3  ;;  %1038 = vmatmul.mubr.f32.gmra.mrb[4].mxu1 %v848_v6  ;;  %v850_v20 = vmul.f32 %v800_v1, %v650_v9 }
 0x193   : > { %v1653_v11 = vpop.eup %1652  ;;  %v708_v12 = vmul.f32 0.70710677, %v2309_v61  ;;  %v851_v14 = vmul.f32 %v801_v7, %v651_v15  ;;  %v658_v5 = vmul.f32 0.5, %v2309_v61 }
 0x194   : > { %v1655_v16 = vpop.eup %1654  ;;  %v802_v17 = vadd.f32 1.0, %v1653_v11  ;;  %v709_v18 = vmul.f32 0.70710677, %v2313_v10  ;;  %v559_v19 = vpop.f32.mrb[24].mxu0  ;;  %v659_v63 = vmul.f32 0.5, %v2313_v10 }
 0x195   : > { %v803_v22 = vadd.f32 1.0, %v1655_v16  ;;  %1664 = verf.f32 %v708_v12  ;;  %v2319_v13 = vadd.f32 %v559_v19, %v2229_v2  ;;  %v561_v24 = vpop.f32.mrb[25].mxu0  ;;  %1042 = vmatprep.mubr.f32.mxu1 %v851_v14 }
 0x196   : > { %1666 = verf.f32 %v709_v18  ;;  %v2323_v26 = vadd.f32 %v561_v24, %v2231_v3  ;;  %1043 = vmatmul.mubr.f32.gmra.mrb[6].mxu1 %v850_v20  ;;  %v852_v35 = vmul.f32 %v802_v17, %v652_v25 }
 0x197   : > { %v1657_v23 = vpop.eup %1656  ;;  %v710_v28 = vmul.f32 0.70710677, %v2319_v13  ;;  %v853_v29 = vmul.f32 %v803_v22, %v653_v21  ;;  %v660_v19 = vmul.f32 0.5, %v2319_v13 }
 0x198   : > { %v1659_v30 = vpop.eup %1658  ;;  %v804_v31 = vadd.f32 1.0, %v1657_v23  ;;  %v711_v32 = vmul.f32 0.70710677, %v2323_v26  ;;  %v565_v33 = vpop.f32.mrb[26].mxu0  ;;  %v661_v16 = vmul.f32 0.5, %v2323_v26 }
 0x199   : > { %v805_v38 = vadd.f32 1.0, %v1659_v30  ;;  %1668 = verf.f32 %v710_v28  ;;  %v2329_v27 = vadd.f32 %v565_v33, %v2229_v2  ;;  %v567_v39 = vpop.f32.mrb[27].mxu0  ;;  %1047 = vmatprep.mubr.f32.mxu1 %v853_v29 }
 0x19a   : > { %1670 = verf.f32 %v711_v32  ;;  %v2333_v41 = vadd.f32 %v567_v39, %v2231_v3  ;;  %1048 = vmatmul.mubr.f32.gmra.mrb[8].mxu1 %v852_v35  ;;  %v854_v49 = vmul.f32 %v804_v31, %v654_v40 }
 0x19b   : > { %v1661_v37 = vpop.eup %1660  ;;  %v712_v42 = vmul.f32 0.70710677, %v2329_v27  ;;  %v855_v43 = vmul.f32 %v805_v38, %v655_v36  ;;  %v662_v33 = vmul.f32 0.5, %v2329_v27 }
 0x19c   : > { %v1663_v44 = vpop.eup %1662  ;;  %v806_v45 = vadd.f32 1.0, %v1661_v37  ;;  %v713_v46 = vmul.f32 0.70710677, %v2333_v41  ;;  %v571_v47 = vpop.f32.mrb[28].mxu0  ;;  %v663_v30 = vmul.f32 0.5, %v2333_v41 }
 0x19d   : > { %v807_v51 = vadd.f32 1.0, %v1663_v44  ;;  %1672 = verf.f32 %v712_v42  ;;  %v2339_v34 = vadd.f32 %v571_v47, %v2229_v2  ;;  %v573_v52 = vpop.f32.mrb[29].mxu0  ;;  %1052 = vmatprep.mubr.f32.mxu1 %v855_v43 }
 0x19e   : > { %1674 = verf.f32 %v713_v46  ;;  %v2343_v54 = vadd.f32 %v573_v52, %v2231_v3  ;;  %1053 = vmatmul.mubr.f32.gmra.mrb[10].mxu1 %v854_v49  ;;  %v856_v62 = vmul.f32 %v806_v45, %v656_v53 }
 0x19f   : > { %v1665_v55 = vpop.eup %1664  ;;  %v714_v56 = vmul.f32 0.70710677, %v2339_v34  ;;  %v857_v57 = vmul.f32 %v807_v51, %v657_v50  ;;  %v664_v47 = vmul.f32 0.5, %v2339_v34 }
 0x1a0   : > { %v1667_v58 = vpop.eup %1666  ;;  %v808_v59 = vadd.f32 1.0, %v1665_v55  ;;  %v715_v0 = vmul.f32 0.70710677, %v2343_v54  ;;  %v577_v60 = vpop.f32.mrb[30].mxu0  ;;  %v665_v44 = vmul.f32 0.5, %v2343_v54 }
 0x1a1   : > { %v809_v1 = vadd.f32 1.0, %v1667_v58  ;;  %1676 = verf.f32 %v714_v56  ;;  %v2349_v48 = vadd.f32 %v577_v60, %v2229_v2  ;;  %v579_v4 = vpop.f32.mrb[31].mxu0  ;;  %1057 = vmatprep.mubr.f32.mxu1 %v857_v57 }
 0x1a2   : > { %1678 = verf.f32 %v715_v0  ;;  %v2353_v6 = vadd.f32 %v579_v4, %v2231_v3  ;;  %1058 = vmatmul.mubr.f32.gmra.mrb[12].mxu1 %v856_v62  ;;  %v858_v14 = vmul.f32 %v808_v59, %v658_v5 }
 0x1a3   : > { %v1669_v15 = vpop.eup %1668  ;;  %v716_v7 = vmul.f32 0.70710677, %v2349_v48  ;;  %v859_v8 = vmul.f32 %v809_v1, %v659_v63  ;;  %v666_v60 = vmul.f32 0.5, %v2349_v48 }
 0x1a4   : > { %v1671_v9 = vpop.eup %1670  ;;  %v810_v10 = vadd.f32 1.0, %v1669_v15  ;;  %v717_v11 = vmul.f32 0.70710677, %v2353_v6  ;;  %v583_v12 = vpop.f32.mrb[32].mxu0  ;;  %v667_v58 = vmul.f32 0.5, %v2353_v6 }
 0x1a5   : > { %v811_v17 = vadd.f32 1.0, %v1671_v9  ;;  %1680 = verf.f32 %v716_v7  ;;  %v2359_v61 = vadd.f32 %v583_v12, %v2229_v2  ;;  %v585_v18 = vpop.f32.mrb[33].mxu0  ;;  %1062 = vmatprep.mubr.f32.mxu1 %v859_v8 }
 0x1a6   : > { %1682 = verf.f32 %v717_v11  ;;  %v2363_v20 = vadd.f32 %v585_v18, %v2231_v3  ;;  %1063 = vmatmul.mubr.f32.gmra.mrb[14].mxu1 %v858_v14  ;;  %v860_v29 = vmul.f32 %v810_v10, %v660_v19 }
 0x1a7   : > { %v1673_v21 = vpop.eup %1672  ;;  %v718_v22 = vmul.f32 0.70710677, %v2359_v61  ;;  %v861_v24 = vmul.f32 %v811_v17, %v661_v16  ;;  %v668_v12 = vmul.f32 0.5, %v2359_v61 }
 0x1a8   : > { %v1675_v25 = vpop.eup %1674  ;;  %v812_v26 = vadd.f32 1.0, %v1673_v21  ;;  %v719_v23 = vmul.f32 0.70710677, %v2363_v20  ;;  %v589_v28 = vpop.f32.mrb[34].mxu0  ;;  %v669_v9 = vmul.f32 0.5, %v2363_v20 }
 0x1a9   : > { %v813_v31 = vadd.f32 1.0, %v1675_v25  ;;  %1684 = verf.f32 %v718_v22  ;;  %v2369_v13 = vadd.f32 %v589_v28, %v2229_v2  ;;  %v591_v32 = vpop.f32.mrb[35].mxu0  ;;  %1067 = vmatprep.mubr.f32.mxu1 %v861_v24 }
 0x1aa   : > { %1686 = verf.f32 %v719_v23  ;;  %v2373_v35 = vadd.f32 %v591_v32, %v2231_v3  ;;  %1068 = vmatmul.mubr.f32.gmra.mrb[16].mxu1 %v860_v29  ;;  %v862_v43 = vmul.f32 %v812_v26, %v662_v33 }
 0x1ab   : > { %v1677_v36 = vpop.eup %1676  ;;  %v720_v38 = vmul.f32 0.70710677, %v2369_v13  ;;  %v863_v39 = vmul.f32 %v813_v31, %v663_v30  ;;  %v670_v28 = vmul.f32 0.5, %v2369_v13 }
 0x1ac   : > { %v1679_v40 = vpop.eup %1678  ;;  %v814_v41 = vadd.f32 1.0, %v1677_v36  ;;  %v721_v37 = vmul.f32 0.70710677, %v2373_v35  ;;  %v595_v42 = vpop.f32.mrb[36].mxu0  ;;  %v671_v25 = vmul.f32 0.5, %v2373_v35 }
 0x1ad   : > { %v815_v45 = vadd.f32 1.0, %v1679_v40  ;;  %1688 = verf.f32 %v720_v38  ;;  %v2379_v27 = vadd.f32 %v595_v42, %v2229_v2  ;;  %v597_v46 = vpop.f32.mrb[37].mxu0  ;;  %1072 = vmatprep.mubr.f32.mxu1 %v863_v39 }
 0x1ae   : > { %1690 = verf.f32 %v721_v37  ;;  %v2383_v49 = vadd.f32 %v597_v46, %v2231_v3  ;;  %1073 = vmatmul.mubr.f32.gmra.mrb[18].mxu1 %v862_v43  ;;  %v864_v57 = vmul.f32 %v814_v41, %v664_v47 }
 0x1af   : > { %v1681_v50 = vpop.eup %1680  ;;  %v722_v51 = vmul.f32 0.70710677, %v2379_v27  ;;  %v865_v52 = vmul.f32 %v815_v45, %v665_v44  ;;  %v672_v42 = vmul.f32 0.5, %v2379_v27 }
 0x1b0   : > { %v1683_v53 = vpop.eup %1682  ;;  %v816_v54 = vadd.f32 1.0, %v1681_v50  ;;  %v723_v55 = vmul.f32 0.70710677, %v2383_v49  ;;  %v601_v56 = vpop.f32.mrb[38].mxu0  ;;  %v673_v40 = vmul.f32 0.5, %v2383_v49 }
 0x1b1   : > { %v817_v59 = vadd.f32 1.0, %v1683_v53  ;;  %1692 = verf.f32 %v722_v51  ;;  %v2389_v34 = vadd.f32 %v601_v56, %v2229_v2  ;;  %v603_v0 = vpop.f32.mrb[39].mxu0  ;;  %1077 = vmatprep.mubr.f32.mxu1 %v865_v52 }
 0x1b2   : > { %1694 = verf.f32 %v723_v55  ;;  %v2393_v62 = vadd.f32 %v603_v0, %v2231_v3  ;;  %1078 = vmatmul.mubr.f32.gmra.mrb[20].mxu1 %v864_v57  ;;  %v866_v8 = vmul.f32 %v816_v54, %v666_v60 }
 0x1b3   : > { %v1685_v63 = vpop.eup %1684  ;;  %v724_v1 = vmul.f32 0.70710677, %v2389_v34  ;;  %v867_v4 = vmul.f32 %v817_v59, %v667_v58  ;;  %v674_v56 = vmul.f32 0.5, %v2389_v34 }
 0x1b4   : > { %v1687_v5 = vpop.eup %1686  ;;  %v818_v6 = vadd.f32 1.0, %v1685_v63  ;;  %v725_v15 = vmul.f32 0.70710677, %v2393_v62  ;;  %v607_v7 = vpop.f32.mrb[40].mxu0  ;;  %v675_v53 = vmul.f32 0.5, %v2393_v62 }
 0x1b5   : > { %v819_v10 = vadd.f32 1.0, %v1687_v5  ;;  %1696 = verf.f32 %v724_v1  ;;  %v2399_v48 = vadd.f32 %v607_v7, %v2229_v2  ;;  %v609_v11 = vpop.f32.mrb[41].mxu0  ;;  %1082 = vmatprep.mubr.f32.mxu1 %v867_v4 }
 0x1b6   : > { %1698 = verf.f32 %v725_v15  ;;  %v2403_v14 = vadd.f32 %v609_v11, %v2231_v3  ;;  %1083 = vmatmul.mubr.f32.gmra.mrb[22].mxu1 %v866_v8  ;;  %v868_v24 = vmul.f32 %v818_v6, %v668_v12 }
 0x1b7   : > { %v1689_v16 = vpop.eup %1688  ;;  %v726_v17 = vmul.f32 0.70710677, %v2399_v48  ;;  %v869_v18 = vmul.f32 %v819_v10, %v669_v9  ;;  %v676_v34 = vmul.f32 0.5, %v2399_v48 }
 0x1b8   : > { %v1691_v19 = vpop.eup %1690  ;;  %v820_v20 = vadd.f32 1.0, %v1689_v16  ;;  %v727_v21 = vmul.f32 0.70710677, %v2403_v14  ;;  %v613_v22 = vpop.f32.mrb[42].mxu0  ;;  %v677_v5 = vmul.f32 0.5, %v2403_v14 }
 0x1b9   : > { %v821_v26 = vadd.f32 1.0, %v1691_v19  ;;  %1700 = verf.f32 %v726_v17  ;;  %v2409_v61 = vadd.f32 %v613_v22, %v2229_v2  ;;  %v615_v23 = vpop.f32.mrb[43].mxu0  ;;  %1087 = vmatprep.mubr.f32.mxu1 %v869_v18 }
 0x1ba   : > { %1702 = verf.f32 %v727_v21  ;;  %v2413_v29 = vadd.f32 %v615_v23, %v2231_v3  ;;  %1088 = vmatmul.mubr.f32.gmra.mrb[24].mxu1 %v868_v24  ;;  %v870_v39 = vmul.f32 %v820_v20, %v670_v28 }
 0x1bb   : > { %v1693_v30 = vpop.eup %1692  ;;  %v728_v31 = vmul.f32 0.70710677, %v2409_v61  ;;  %v871_v32 = vmul.f32 %v821_v26, %v671_v25 }
 0x1bc   : > { %v1695_v33 = vpop.eup %1694  ;;  %v822_v35 = vadd.f32 1.0, %v1693_v30  ;;  %v729_v36 = vmul.f32 0.70710677, %v2413_v29  ;;  %v619_v38 = vpop.f32.mrb[44].mxu0  ;;  %v679_v14 = vmul.f32 0.5, %v2413_v29 }
 0x1bd   : > { %v823_v41 = vadd.f32 1.0, %v1695_v33  ;;  %1704 = verf.f32 %v728_v31  ;;  %v2419_v13 = vadd.f32 %v619_v38, %v2229_v2  ;;  %v621_v37 = vpop.f32.mrb[45].mxu0  ;;  %1092 = vmatprep.mubr.f32.mxu1 %v871_v32 }
 0x1be   : > { %1706 = verf.f32 %v729_v36  ;;  %v622_v43 = vadd.f32 %v621_v37, %v2231_v3  ;;  %1093 = vmatmul.mubr.f32.gmra.mrb[26].mxu1 %v870_v39  ;;  %v872_v52 = vmul.f32 %v822_v35, %v672_v42 }
 0x1bf   : > { %v1697_v44 = vpop.eup %1696  ;;  %v730_v45 = vmul.f32 0.70710677, %v2419_v13  ;;  %v873_v46 = vmul.f32 %v823_v41, %v673_v40  ;;  %v680_v26 = vmul.f32 0.5, %v2419_v13 }
 0x1c0   : > { %v1699_v47 = vpop.eup %1698  ;;  %v824_v50 = vadd.f32 1.0, %v1697_v44  ;;  %v731_v49 = vmul.f32 0.70710677, %v622_v43  ;;  %v625_v51 = vpop.f32.mrb[46].mxu0  ;;  %v681_v24 = vmul.f32 0.5, %v622_v43 }
 0x1c1   : > { %v825_v54 = vadd.f32 1.0, %v1699_v47  ;;  %1708 = verf.f32 %v730_v45  ;;  %v626_v55 = vadd.f32 %v625_v51, %v2229_v2  ;;  %v627_v27 = vpop.f32.mrb[47].mxu0  ;;  %1097 = vmatprep.mubr.f32.mxu1 %v873_v46  ;;  %v2438_v44 = vld [vmem:[%s2554_s4] ss:$0 sm:$0xff] }
 0x1c2   : > { %1710 = verf.f32 %v731_v49  ;;  %v628_v57 = vadd.f32 %v627_v27, %v2231_v3  ;;  %1098 = vmatmul.mubr.f32.gmra.mrb[28].mxu1 %v872_v52  ;;  %v874_v62 = vmul.f32 %v824_v50, %v674_v56 }
 0x1c3   : > { %v1701_v58 = vpop.eup %1700  ;;  %v732_v59 = vmul.f32 0.70710677, %v626_v55  ;;  %v875_v0 = vmul.f32 %v825_v54, %v675_v53  ;;  %v682_v33 = vmul.f32 0.5, %v626_v55 }
 0x1c4   : > { %v1703_v60 = vpop.eup %1702  ;;  %v826_v63 = vadd.f32 1.0, %v1701_v58  ;;  %v733_v1 = vmul.f32 0.70710677, %v628_v57  ;;  %v631_v4 = vpop.f32.mrb[48].mxu0  ;;  %v683_v32 = vmul.f32 0.5, %v628_v57 }
 0x1c5   : > { %v827_v6 = vadd.f32 1.0, %v1703_v60  ;;  %1712 = verf.f32 %v732_v59  ;;  %v632_v15 = vadd.f32 %v631_v4, %v2229_v2  ;;  %v633_v7 = vpop.f32.mrb[49].mxu0  ;;  %1102 = vmatprep.mubr.f32.mxu1 %v875_v0  ;;  %v678_v2 = vmul.f32 0.5, %v2409_v61 }
 0x1c6   : > { %1714 = verf.f32 %v733_v1  ;;  %v634_v8 = vadd.f32 %v633_v7, %v2231_v3  ;;  %1103 = vmatmul.mubr.f32.gmra.mrb[30].mxu1 %v874_v62  ;;  %v876_v18 = vmul.f32 %v826_v63, %v676_v34 }
 0x1c7   : > { %v1705_v9 = vpop.eup %1704  ;;  %v734_v10 = vmul.f32 0.70710677, %v632_v15  ;;  %v877_v11 = vmul.f32 %v827_v6, %v677_v5  ;;  %v684_v13 = vmul.f32 0.5, %v632_v15 }
 0x1c8   : > { %v1707_v12 = vpop.eup %1706  ;;  %v828_v16 = vadd.f32 1.0, %v1705_v9  ;;  %v735_v17 = vmul.f32 0.70710677, %v634_v8  ;;  %v685_v41 = vmul.f32 0.5, %v634_v8 }
 0x1c9   : > { %v829_v19 = vadd.f32 1.0, %v1707_v12  ;;  %1716 = verf.f32 %v734_v10  ;;  %1107 = vmatprep.mubr.f32.mxu1 %v877_v11 }
 0x1ca   : > { %1718 = verf.f32 %v735_v17  ;;  %1108 = vmatmul.mubr.f32.gmra.mrb[32].mxu1 %v876_v18  ;;  %v878_v22 = vmul.f32 %v828_v16, %v678_v2 }
 0x1cb   : > { %v1709_v48 = vpop.eup %1708  ;;  %v879_v20 = vmul.f32 %v829_v19, %v679_v14 }
 0x1cc   : > { %v1711_v3 = vpop.eup %1710  ;;  %v830_v21 = vadd.f32 1.0, %v1709_v48 }
 0x1cd   : > { %v831_v25 = vadd.f32 1.0, %v1711_v3  ;;  %1112 = vmatprep.mubr.f32.mxu1 %v879_v20 }
 0x1ce   : > { %1113 = vmatmul.mubr.f32.gmra.mrb[34].mxu1 %v878_v22  ;;  %v880_v31 = vmul.f32 %v830_v21, %v680_v26 }
 0x1cf   : > { %v1713_v23 = vpop.eup %1712  ;;  %v881_v28 = vmul.f32 %v831_v25, %v681_v24 }
 0x1d0   : > { %v1715_v29 = vpop.eup %1714  ;;  %v832_v30 = vadd.f32 1.0, %v1713_v23 }
 0x1d1   : > { %v833_v61 = vadd.f32 1.0, %v1715_v29  ;;  %1117 = vmatprep.mubr.f32.mxu1 %v881_v28 }
 0x1d2   : > { %1118 = vmatmul.mubr.f32.gmra.mrb[36].mxu1 %v880_v31  ;;  %v882_v40 = vmul.f32 %v832_v30, %v682_v33 }
 0x1d3   : > { %v1717_v35 = vpop.eup %1716  ;;  %v883_v36 = vmul.f32 %v833_v61, %v683_v32 }
 0x1d4   : > { %v1719_v38 = vpop.eup %1718  ;;  %v834_v39 = vadd.f32 1.0, %v1717_v35 }
 0x1d5   : > { %v835_v37 = vadd.f32 1.0, %v1719_v38  ;;  %1122 = vmatprep.mubr.f32.mxu1 %v883_v36 }
 0x1d6   : > { %1123 = vmatmul.mubr.f32.gmra.mrb[38].mxu1 %v882_v40  ;;  %v884_v43 = vmul.f32 %v834_v39, %v684_v13 }
 0x1d7   : > { %v885_v42 = vmul.f32 %v835_v37, %v685_v41 }
 0x1d9   : > { %1127 = vmatprep.mubr.f32.mxu1 %v885_v42 }
 0x1da   : > { %1128 = vmatmul.mubr.f32.gmra.mrb[40].mxu1 %v884_v43 }
 0x24d   : > { %v1009_v45 = vpop.f32.mrb[50].mxu0 }
 0x24e   : > { %v1218_v46 = vadd.f32 %v2438_v44, %v1009_v45  ;;  %v1011_v47 = vpop.f32.mrb[51].mxu0 }
 0x250   : > { %1243 = vst [vmem:[%s2443_s9] sm:$0xff] %v1218_v46 }
 0x251   : > { %v1014_v50 = vpop.f32.mrb[52].mxu0 }
 0x252   : > { %v1219_v49 = vadd.f32 %v2438_v44, %v1014_v50  ;;  %v1016_v51 = vpop.f32.mrb[53].mxu0 }
 0x254   : > { %1244 = vst [vmem:[%s2443_s9 + $0x8] sm:$0xff] %v1219_v49 }
 0x255   : > { %v1019_v52 = vpop.f32.mrb[54].mxu0 }
 0x256   : > { %v1220_v53 = vadd.f32 %v2438_v44, %v1019_v52  ;;  %v1021_v54 = vpop.f32.mrb[55].mxu0 }
 0x258   : > { %1245 = vst [vmem:[%s2443_s9 + $0x10] sm:$0xff] %v1220_v53 }
 0x259   : > { %v1024_v55 = vpop.f32.mrb[56].mxu0 }
 0x25a   : > { %v1221_v27 = vadd.f32 %v2438_v44, %v1024_v55  ;;  %v1026_v56 = vpop.f32.mrb[57].mxu0 }
 0x25c   : > { %1246 = vst [vmem:[%s2443_s9 + $0x18] sm:$0xff] %v1221_v27 }
 0x25d   : > { %v1029_v57 = vpop.f32.mrb[0].mxu1 }
 0x25e   : > { %v1222_v58 = vadd.f32 %v2438_v44, %v1029_v57  ;;  %v1031_v59 = vpop.f32.mrb[1].mxu1 }
 0x260   : > { %1247 = vst [vmem:[%s2443_s9 + $0x20] sm:$0xff] %v1222_v58 }
 0x261   : > { %v1034_v0 = vpop.f32.mrb[2].mxu1 }
 0x262   : > { %v1223_v60 = vadd.f32 %v2438_v44, %v1034_v0  ;;  %v1036_v63 = vpop.f32.mrb[3].mxu1 }
 0x264   : > { %1248 = vst [vmem:[%s2443_s9 + $0x28] sm:$0xff] %v1223_v60 }
 0x265   : > { %v1039_v1 = vpop.f32.mrb[4].mxu1 }
 0x266   : > { %v1224_v4 = vadd.f32 %v2438_v44, %v1039_v1  ;;  %v1041_v62 = vpop.f32.mrb[5].mxu1 }
 0x268   : > { %1249 = vst [vmem:[%s2443_s9 + $0x30] sm:$0xff] %v1224_v4 }
 0x269   : > { %v1044_v5 = vpop.f32.mrb[6].mxu1 }
 0x26a   : > { %v1225_v6 = vadd.f32 %v2438_v44, %v1044_v5  ;;  %v1046_v15 = vpop.f32.mrb[7].mxu1 }
 0x26c   : > { %1250 = vst [vmem:[%s2443_s9 + $0x38] sm:$0xff] %v1225_v6 }
 0x26d   : > { %v1049_v7 = vpop.f32.mrb[8].mxu1 }
 0x26e   : > { %v1226_v34 = vadd.f32 %v2438_v44, %v1049_v7  ;;  %v1051_v8 = vpop.f32.mrb[9].mxu1 }
 0x270   : > { %1251 = vst [vmem:[%s2443_s9 + $0x40] sm:$0xff] %v1226_v34 }
 0x271   : > { %v1054_v9 = vpop.f32.mrb[10].mxu1 }
 0x272   : > { %v1227_v10 = vadd.f32 %v2438_v44, %v1054_v9  ;;  %v1056_v11 = vpop.f32.mrb[11].mxu1 }
 0x274   : > { %1252 = vst [vmem:[%s2443_s9 + $0x48] sm:$0xff] %v1227_v10 }
 0x275   : > { %v1059_v12 = vpop.f32.mrb[12].mxu1 }
 0x276   : > { %v1228_v16 = vadd.f32 %v2438_v44, %v1059_v12  ;;  %v1061_v17 = vpop.f32.mrb[13].mxu1 }
 0x278   : > { %1253 = vst [vmem:[%s2443_s9 + $0x50] sm:$0xff] %v1228_v16 }
 0x279   : > { %v1064_v18 = vpop.f32.mrb[14].mxu1 }
 0x27a   : > { %v1229_v14 = vadd.f32 %v2438_v44, %v1064_v18  ;;  %v1066_v19 = vpop.f32.mrb[15].mxu1 }
 0x27c   : > { %1254 = vst [vmem:[%s2443_s9 + $0x58] sm:$0xff] %v1229_v14 }
 0x27d   : > { %v1069_v2 = vpop.f32.mrb[16].mxu1 }
 0x27e   : > { %v1230_v48 = vadd.f32 %v2438_v44, %v1069_v2  ;;  %v1071_v20 = vpop.f32.mrb[17].mxu1 }
 0x280   : > { %1255 = vst [vmem:[%s2443_s9 + $0x60] sm:$0xff] %v1230_v48 }
 0x281   : > { %v1074_v3 = vpop.f32.mrb[18].mxu1 }
 0x282   : > { %v1231_v21 = vadd.f32 %v2438_v44, %v1074_v3  ;;  %v1076_v22 = vpop.f32.mrb[19].mxu1 }
 0x284   : > { %1256 = vst [vmem:[%s2443_s9 + $0x68] sm:$0xff] %v1231_v21 }
 0x285   : > { %v1079_v24 = vpop.f32.mrb[20].mxu1 }
 0x286   : > { %v1232_v25 = vadd.f32 %v2438_v44, %v1079_v24  ;;  %v1081_v26 = vpop.f32.mrb[21].mxu1 }
 0x288   : > { %1257 = vst [vmem:[%s2443_s9 + $0x70] sm:$0xff] %v1232_v25 }
 0x289   : > { %v1084_v23 = vpop.f32.mrb[22].mxu1 }
 0x28a   : > { %v1233_v28 = vadd.f32 %v2438_v44, %v1084_v23  ;;  %v1086_v29 = vpop.f32.mrb[23].mxu1 }
 0x28c   : > { %1258 = vst [vmem:[%s2443_s9 + $0x78] sm:$0xff] %v1233_v28 }
 0x28d   : > { %v1089_v30 = vpop.f32.mrb[24].mxu1 }
 0x28e   : > { %v1234_v31 = vadd.f32 %v2438_v44, %v1089_v30  ;;  %v1091_v32 = vpop.f32.mrb[25].mxu1 }
 0x290   : > { %1259 = vst [vmem:[%s2443_s9 + $0x80] sm:$0xff] %v1234_v31 }
 0x291   : > { %v1094_v61 = vpop.f32.mrb[26].mxu1 }
 0x292   : > { %v1235_v33 = vadd.f32 %v2438_v44, %v1094_v61  ;;  %v1096_v35 = vpop.f32.mrb[27].mxu1 }
 0x294   : > { %1260 = vst [vmem:[%s2443_s9 + $0x88] sm:$0xff] %v1235_v33 }
 0x295   : > { %v1099_v36 = vpop.f32.mrb[28].mxu1 }
 0x296   : > { %v1236_v38 = vadd.f32 %v2438_v44, %v1099_v36  ;;  %v1101_v39 = vpop.f32.mrb[29].mxu1 }
 0x298   : > { %1261 = vst [vmem:[%s2443_s9 + $0x90] sm:$0xff] %v1236_v38 }
 0x299   : > { %v1104_v40 = vpop.f32.mrb[30].mxu1 }
 0x29a   : > { %v1237_v41 = vadd.f32 %v2438_v44, %v1104_v40  ;;  %v1106_v37 = vpop.f32.mrb[31].mxu1 }
 0x29c   : > { %1262 = vst [vmem:[%s2443_s9 + $0x98] sm:$0xff] %v1237_v41 }
 0x29d   : > { %v1109_v13 = vpop.f32.mrb[32].mxu1 }
 0x29e   : > { %v1238_v42 = vadd.f32 %v2438_v44, %v1109_v13  ;;  %v1111_v43 = vpop.f32.mrb[33].mxu1 }
 0x2a0   : > { %1263 = vst [vmem:[%s2443_s9 + $0xa0] sm:$0xff] %v1238_v42 }
 0x2a1   : > { %v1114_v45 = vpop.f32.mrb[34].mxu1 }
 0x2a2   : > { %v1239_v46 = vadd.f32 %v2438_v44, %v1114_v45  ;;  %v1116_v47 = vpop.f32.mrb[35].mxu1 }
 0x2a4   : > { %1264 = vst [vmem:[%s2443_s9 + $0xa8] sm:$0xff] %v1239_v46 }
 0x2a5   : > { %v1119_v50 = vpop.f32.mrb[36].mxu1 }
 0x2a6   : > { %v1240_v49 = vadd.f32 %v2438_v44, %v1119_v50  ;;  %v1121_v51 = vpop.f32.mrb[37].mxu1 }
 0x2a8   : > { %1265 = vst [vmem:[%s2443_s9 + $0xb0] sm:$0xff] %v1240_v49 }
 0x2a9   : > { %v1124_v52 = vpop.f32.mrb[38].mxu1 }
 0x2aa   : > { %v1241_v53 = vadd.f32 %v2438_v44, %v1124_v52  ;;  %v1126_v54 = vpop.f32.mrb[39].mxu1 }
 0x2ac   : > { %1266 = vst [vmem:[%s2443_s9 + $0xb8] sm:$0xff] %v1241_v53 }
 0x2ad   : > { %v1129_v55 = vpop.f32.mrb[40].mxu1 }
 0x2ae   : > { %v1242_v27 = vadd.f32 %v2438_v44, %v1129_v55  ;;  %v1131_v56 = vpop.f32.mrb[41].mxu1 }
 0x2b0   : > { %1267 = vst [vmem:[%s2443_s9 + $0xc0] sm:$0xff] %v1242_v27 }
 0x2b1   : > { %1819 = shalt.err (!%p1816_p2)
}
 0x2b2   : > { %s1820_s26 = scalar_lea.hbm %s2497_s6, 3200  ;;  %s1824_s25 = scalar_lea.hbm %s2555_s5, 6400 }
 0x2b3   : > { %p1821_p0 = scmp.ne.s32.totalorder %s2497_s6, %s1820_s26  ;;  %p1825_p6 = scmp.lt.u32.totalorder %s2497_s6, %s2555_s5 }
 0x2b4   : > { %p1826_p7 = scmp.lt.u32.totalorder %s1824_s25, %s1820_s26  ;;  %p1828_p8 = scmp.lt.u32.totalorder %s1820_s26, %s2497_s6 }
 0x2b5   : > { %p1822_p4 = pnand %p1821_p0, %p2574_p12 }
 0x2b6   : > { %p1827_p11 = por %p1826_p7, %p1825_p6 }
 0x2b7   : > { %p1823_p13 = pneg %p1822_p4 }
 0x2b8   : > { %p1829_p1 = por %p1828_p8, %p1827_p11 }
 0x2ba   : > { %p1830_p10 = pnand %p1829_p1, %p1823_p13 }
 0x2bc   : > { %1833 = shalt.err (!%p1830_p10)
}
 0x2bd   : > { %s1904_s13 = smov 128   ;;  %s1905_s10 = smov 8  }
 0x2be   : > { %1539 = dma.vmem_to_hbm [thread:$0]  (%p2574_p12), %s2499_s11, 3200, %s2497_s6, %s1269_s21, %s1904_s13, %s1904_s13, %s1905_s10  }
 0x2bf PF: > { %s1297_s24 = sand.u32 1, %s1872_s18   ;;  %p2575_p3 = scmp.ne.s32.totalorder %s2565_s29, 0 }
 0x2c0   : > { %p2576_p5 = scmp.ge.s32.totalorder %s1892_s23, 2  ;;  %s1298_s27 = scalar_lea.sflag [#allocation5], %s1297_s24 }
 0x2c2   : > { %p1553_p9 = pnand %p2576_p5, %p2575_p3 }
 0x2c4   : > { %1867 = dma.done.wait (!%p1553_p9), %s1298_s27, 3200  }
 0x2c5   : > { %1869 = vsyncadd (!%p1553_p9), %s1298_s27, 4294964096  ;;  %s22_s23 = sadd.s32 1, %s1892_s23   ;;  %s2577_s18 = smov %s1876_s19 }
 0x2c6   : > { %p19_p2 = scmp.ge.s32.totalorder %s22_s23, 4   ;;  %s2578_s19 = smov %s1880_s20 }
 0x2c7   : > { %s2579_s20 = smov %s2084_s17  ;;  %s2580_s21 = smov %s1888_s22 }
 0x2c8   : > { %s2581_s22 = smov %s2583_s12  ;;  %21 = sbr.rel (!%p19_p2) target bundleno = 7 (0x7), region = 106 }
 0x2cf   :  { %1303 = vsyncpa [#allocation4], 1 }
 0x2d0   :  { %1305 = vsyncpa [#allocation4 + $0x1], 1 }
 0x2d1   :  { %1306 = vsyncpa [#allocation7], 1 }
 0x2d2   :  { %1307 = vsyncpa [#allocation5], 1 }
 0x2d3   :  { %1309 = vsyncpa [#allocation5 + $0x1], 1 }

</bundles_post_ra>
